<compile_context>
chip_gen: v5e
topology: v5e:2x2
jax: 0.10.0
libtpu: 0.0.40
codegen_flags: <defaults>
</compile_context>

<pallas_src>
import functools

import jax
import jax.numpy as jnp
from jax.experimental import pallas as pl
from jax.experimental.pallas import tpu as pltpu


# ----------------------------------------------------------------------------
# Config (small synthetic BERT; shapes follow the module's __init__ semantics)
# ----------------------------------------------------------------------------
CFG = dict(
    vocab_size=512,
    max_position=64,
    type_vocab=2,
    hidden=128,
    num_heads=2,
    head_dim=64,
    intermediate=256,
    num_layers=2,
    ln_eps=1e-12,
    num_sentiment_labels=5,
)


# ----------------------------------------------------------------------------
# Fused encoder kernel
# ----------------------------------------------------------------------------
def _gelu(x):
    # TODO(synk): HF BERT uses exact erf-GELU; tanh approximation used here
    # (kept in f32 so it is v5e-safe on the VPU/EUP).
    return 0.5 * x * (1.0 + jnp.tanh(0.7978845608028654 * (x + 0.044715 * x * x * x)))


def _encoder_kernel(emb_ref, mask_ref, emb_g_ref, emb_b_ref,
                    wqkv_ref, bqkv_ref, wo_ref, bo_ref, ln1_g_ref, ln1_b_ref,
                    w1_ref, b1_ref, w2_ref, b2_ref, ln2_g_ref, ln2_b_ref,
                    pw_ref, pb_ref,
                    pooled_ref,
                    *, num_layers, num_heads, head_dim, eps):
    """One grid step = Bt sentences: full encoder stack + pooler, VMEM-resident.

    All big matmuls run on a flattened [Bt*S, H] slab (MXU M-fill); only the
    per-sentence score / context attention math keeps the [Bt, S, *] shape
    (batched dot_general over the sentence dim).
    """
    f32 = jnp.float32
    bf16 = jnp.bfloat16
    H = num_heads * head_dim
    Bt, S, _ = emb_ref.shape
    M = Bt * S

    def ln(x, g, b):
        mu = jnp.mean(x, axis=-1, keepdims=True)
        var = jnp.mean(jnp.square(x - mu), axis=-1, keepdims=True)
        return (x - mu) * jax.lax.rsqrt(var + eps) * g + b

    # Embedding LayerNorm, flattened to [M, H] for all subsequent matmuls.
    h = ln(emb_ref[...].astype(f32).reshape(M, H), emb_g_ref[...], emb_b_ref[...])

    # Additive attention-mask bias computed in-kernel from the [Bt, 1, S] mask.
    bias = (1.0 - mask_ref[...]) * -10000.0                              # [Bt, 1, S]

    scale = 1.0 / (head_dim ** 0.5)

    for l in range(num_layers):
        # ---- fused Q/K/V projection: [M, H] @ [H, 3H] --------------------
        qkv = jnp.dot(h.astype(bf16), wqkv_ref[l],
                      preferred_element_type=f32) + bqkv_ref[l]          # [M, 3H]
        qkv3 = qkv.reshape(Bt, S, 3 * H)

        # ---- multi-head attention, batched over the Bt sentences ---------
        # TODO(synk): with num_heads=2 the head loop is unrolled; for many
        # heads fold the head dim into the dot_general batch dims instead.
        ctx_heads = []
        for hd in range(num_heads):
            lo = hd * head_dim
            qh = qkv3[:, :, lo:lo + head_dim].astype(bf16)               # [Bt, S, dH]
            kh = qkv3[:, :, H + lo:H + lo + head_dim].astype(bf16)       # [Bt, S, dH]
            vh = qkv3[:, :, 2 * H + lo:2 * H + lo + head_dim].astype(bf16)

            # batched q @ k^T (contract on dH, batch on sentences)
            s = jax.lax.dot_general(qh, kh, (((2,), (2,)), ((0,), (0,))),
                                    preferred_element_type=f32)          # [Bt, S, S]
            s = s * scale + bias
            s = s - jnp.max(s, axis=-1, keepdims=True)
            p = jnp.exp(s)
            p = p * pl.reciprocal(jnp.sum(p, axis=-1, keepdims=True), approx=True)

            ctx_heads.append(
                jax.lax.dot_general(p.astype(bf16), vh,
                                    (((2,), (1,)), ((0,), (0,))),
                                    preferred_element_type=f32))         # [Bt, S, dH]

        # merge heads into contiguous lane halves -> ONE K=128 wo matmul
        ctx = jnp.concatenate(ctx_heads, axis=-1).reshape(M, H)          # [M, H]
        attn = jnp.dot(ctx.astype(bf16), wo_ref[l],
                       preferred_element_type=f32) + bo_ref[l]           # [M, H]
        h = ln(attn + h, ln1_g_ref[l], ln1_b_ref[l])                     # Add & Norm 1

        # ---- FFN: w1 -> GELU -> w2 -> Add & Norm 2 ------------------------
        ff = jnp.dot(h.astype(bf16), w1_ref[l],
                     preferred_element_type=f32) + b1_ref[l]             # [M, I]
        ff = _gelu(ff)
        ff = jnp.dot(ff.astype(bf16), w2_ref[l],
                     preferred_element_type=f32) + b2_ref[l]             # [M, H]
        h = ln(ff + h, ln2_g_ref[l], ln2_b_ref[l])

    # ---- Pooler: dense + tanh on the [CLS] token of every sentence --------
    cls = h.reshape(Bt, S, H)[:, 0, :]                                   # [Bt, H]
    pooled = jnp.tanh(jnp.dot(cls.astype(bf16), pw_ref[...],
                              preferred_element_type=f32) + pb_ref[...])
    # TODO(synk): nn.Dropout(hidden_dropout_prob) is identity at inference.
    pooled_ref[...] = pooled.astype(pooled_ref.dtype)                    # dense (Bt, H) store


# ----------------------------------------------------------------------------
# Grid sizing & VMEM budget
# ----------------------------------------------------------------------------
def _choose_bt(B, S, target_rows=256, min_steps=2):
    """Sentences per grid step: approach `target_rows` MXU rows (128 would
    already fill v5e; 256 targets v6e/v7x) while keeping >=2 parallel grid
    steps so both v7x TensorCores get work."""
    bt = max(1, target_rows // S)
    if B >= min_steps:
        bt = min(bt, B // min_steps)
    bt = max(1, min(bt, B))
    while B % bt:          # must divide B exactly
        bt -= 1
    return bt


def _vmem_budget_bytes(cfg, Bt, S):
    H, I, L = cfg["hidden"], cfg["intermediate"], cfg["num_layers"]
    f32, bf16 = 4, 2
    weights = (2 * H * f32
               + L * (H * 3 * H * bf16 + 3 * H * f32
                      + H * H * bf16 + H * f32
                      + 4 * H * f32
                      + H * I * bf16 + I * f32
                      + I * H * bf16 + H * f32)
               + H * H * bf16 + H * f32)
    streamed = 2 * (Bt * S * H * f32 + Bt * S * f32 + Bt * H * f32)   # double-buffered blocks
    temps = Bt * S * (H + 3 * H + I + 2 * S) * f32 * 4                # in-kernel temporaries (generous)
    return weights + streamed + temps


# ----------------------------------------------------------------------------
# Encoder wrapper (== MultitaskBERT.forward: BERT encoder + pooler -> [B, H])
# ----------------------------------------------------------------------------
def bert_pooled_output(params, input_ids, attention_mask, cfg):
    B, S = input_ids.shape
    H = cfg["hidden"]

    # Embedding gathers stay in XLA (data-dependent gather is glue).
    # TODO(synk): token_type_ids assumed all-zero (reference never passes them).
    emb = (params["word_emb"][input_ids]
           + params["pos_emb"][:S][None, :, :]
           + params["tok_emb"][0][None, None, :]).astype(jnp.float32)    # [B, S, H]
    mask = attention_mask.astype(jnp.float32).reshape(B, 1, S)           # [B, 1, S]

    Bt = _choose_bt(B, S)
    nsteps = B // Bt

    weight_args = (params["emb_ln_g"], params["emb_ln_b"],
                   params["wqkv"], params["bqkv"], params["wo"], params["bo"],
                   params["ln1_g"], params["ln1_b"],
                   params["w1"], params["b1"], params["w2"], params["b2"],
                   params["ln2_g"], params["ln2_b"],
                   params["pooler_w"], params["pooler_b"])

    # Invariant weights: whole-array resident in VMEM (no per-step re-DMA,
    # no double buffering).
    # TODO(synk): for real BERT-base scale (stacked weights > v7x's 64 MiB
    # VMEM) add a layer grid axis ("arbitrary") / emit_pipeline to stream one
    # layer's weights at a time while carrying h in VMEM scratch.
    weight_spec = pl.BlockSpec(memory_space=pltpu.MemorySpace.VMEM)

    kernel = functools.partial(_encoder_kernel,
                               num_layers=cfg["num_layers"],
                               num_heads=cfg["num_heads"],
                               head_dim=cfg["head_dim"],
                               eps=cfg["ln_eps"])

    vmem_limit = int(min(64 * 2**20,
                         max(8 * 2**20, 2 * _vmem_budget_bytes(cfg, Bt, S))))

    pooled = pl.pallas_call(
        kernel,
        out_shape=jax.ShapeDtypeStruct((nsteps, Bt, H), jnp.float32),
        grid=(nsteps,),
        in_specs=[pl.BlockSpec((Bt, S, H), lambda i: (i, 0, 0)),   # embeddings tile
                  pl.BlockSpec((Bt, 1, S), lambda i: (i, 0, 0))]   # attention mask tile
                 + [weight_spec] * len(weight_args),
        out_specs=pl.BlockSpec((None, Bt, H), lambda i: (i, 0, 0)),
        compiler_params=pltpu.CompilerParams(
            dimension_semantics=("parallel",),
            vmem_limit_bytes=vmem_limit),
    )(emb, mask, *weight_args)
    return pooled.reshape(B, H)


# ----------------------------------------------------------------------------
# Task heads (tiny M, N<=5 matmuls -> plain XLA per perf review)
# ----------------------------------------------------------------------------
def predict_sentiment(params, input_ids, attention_mask, cfg):
    pooled = bert_pooled_output(params, input_ids, attention_mask, cfg)
    return pooled @ params["sentiment_w"] + params["sentiment_b"]


def _pair_pooled(params, ids1, mask1, ids2, mask2, cfg):
    # One pallas_call for both sentence batches: halves launches, doubles M,
    # and guarantees both v7x cores have work even at small B.
    ids = jnp.concatenate([ids1, ids2], axis=0)
    mask = jnp.concatenate([mask1, mask2], axis=0)
    pooled = bert_pooled_output(params, ids, mask, cfg)
    B = ids1.shape[0]
    return pooled[:B], pooled[B:]


def predict_paraphrase(params, ids1, mask1, ids2, mask2, cfg):
    p1, p2 = _pair_pooled(params, ids1, mask1, ids2, mask2, cfg)
    return jnp.abs(p1 - p2) @ params["paraphrase_w"] + params["paraphrase_b"]


def predict_similarity(params, ids1, mask1, ids2, mask2, cfg):
    p1, p2 = _pair_pooled(params, ids1, mask1, ids2, mask2, cfg)
    return jnp.abs(p1 - p2) @ params["similarity_w"] + params["similarity_b"]


# ----------------------------------------------------------------------------
# Parameter initialization (deterministic, synthetic; weights pre-stacked
# per-layer as [L, ...] and MXU operands pre-cast to bf16)
# ----------------------------------------------------------------------------
def init_params(key, cfg):
    H, I, L = cfg["hidden"], cfg["intermediate"], cfg["num_layers"]
    keys = iter(jax.random.split(key, 32))
    bf16 = jnp.bfloat16

    def nrm(shape, dtype=jnp.float32):
        return (0.02 * jax.random.normal(next(keys), shape, jnp.float32)).astype(dtype)

    return dict(
        word_emb=nrm((cfg["vocab_size"], H)),
        pos_emb=nrm((cfg["max_position"], H)),
        tok_emb=nrm((cfg["type_vocab"], H)),
        emb_ln_g=jnp.ones((1, H), jnp.float32),
        emb_ln_b=jnp.zeros((1, H), jnp.float32),
        # encoder layers, stacked over L (MXU weights in bf16, the rest f32)
        wqkv=nrm((L, H, 3 * H), bf16),
        bqkv=jnp.zeros((L, 1, 3 * H), jnp.float32),
        wo=nrm((L, H, H), bf16),
        bo=jnp.zeros((L, 1, H), jnp.float32),
        ln1_g=jnp.ones((L, 1, H), jnp.float32),
        ln1_b=jnp.zeros((L, 1, H), jnp.float32),
        w1=nrm((L, H, I), bf16),
        b1=jnp.zeros((L, 1, I), jnp.float32),
        w2=nrm((L, I, H), bf16),
        b2=jnp.zeros((L, 1, H), jnp.float32),
        ln2_g=jnp.ones((L, 1, H), jnp.float32),
        ln2_b=jnp.zeros((L, 1, H), jnp.float32),
        pooler_w=nrm((H, H), bf16),
        pooler_b=jnp.zeros((1, H), jnp.float32),
        # task heads (nn.Linear(hidden, 5) / (hidden, 1) / (hidden, 1))
        sentiment_w=nrm((H, cfg["num_sentiment_labels"])),
        sentiment_b=jnp.zeros((cfg["num_sentiment_labels"],), jnp.float32),
        paraphrase_w=nrm((H, 1)),
        paraphrase_b=jnp.zeros((1,), jnp.float32),
        similarity_w=nrm((H, 1)),
        similarity_b=jnp.zeros((1,), jnp.float32),
    )


# ----------------------------------------------------------------------------
# Main
# ----------------------------------------------------------------------------
if __name__ == "__main__":
    B, S = 4, 8
    key = jax.random.PRNGKey(0)
    k_param, k_ids1, k_ids2 = jax.random.split(key, 3)

    params = init_params(k_param, CFG)

    input_ids_1 = jax.random.randint(k_ids1, (B, S), 0, CFG["vocab_size"], jnp.int32)
    input_ids_2 = jax.random.randint(k_ids2, (B, S), 0, CFG["vocab_size"], jnp.int32)
    attention_mask_1 = jnp.ones((B, S), jnp.int32).at[1, 6:].set(0)
    attention_mask_2 = jnp.ones((B, S), jnp.int32).at[0, 5:].set(0)

    sent_fn = jax.jit(functools.partial(predict_sentiment, cfg=CFG))
    para_fn = jax.jit(functools.partial(predict_paraphrase, cfg=CFG))
    sim_fn = jax.jit(functools.partial(predict_similarity, cfg=CFG))

    sent_logits = sent_fn(params, input_ids_1, attention_mask_1)
    para_logit = para_fn(params, input_ids_1, attention_mask_1,
                         input_ids_2, attention_mask_2)
    sim_score = sim_fn(params, input_ids_1, attention_mask_1,
                       input_ids_2, attention_mask_2)

    jax.block_until_ready((sent_logits, para_logit, sim_score))
    assert sent_logits.shape == (B, 5)
    assert para_logit.shape == (B, 1)
    assert sim_score.shape == (B, 1)
    assert bool(jnp.all(jnp.isfinite(sent_logits)))
    assert bool(jnp.all(jnp.isfinite(para_logit)))
    assert bool(jnp.all(jnp.isfinite(sim_score)))
    print("KERNEL_OK")
</pallas_src>

<mosaic_0001>
module attributes {stable_mosaic.version = 11 : i64} {
  func.func @_encoder_kernel(%arg0: i32, %arg1: memref<2x8x128xf32, #tpu.memory_space<vmem>>, %arg2: memref<2x1x8xf32, #tpu.memory_space<vmem>>, %arg3: memref<1x128xf32, #tpu.memory_space<vmem>>, %arg4: memref<1x128xf32, #tpu.memory_space<vmem>>, %arg5: memref<2x128x384xbf16, #tpu.memory_space<vmem>>, %arg6: memref<2x1x384xf32, #tpu.memory_space<vmem>>, %arg7: memref<2x128x128xbf16, #tpu.memory_space<vmem>>, %arg8: memref<2x1x128xf32, #tpu.memory_space<vmem>>, %arg9: memref<2x1x128xf32, #tpu.memory_space<vmem>>, %arg10: memref<2x1x128xf32, #tpu.memory_space<vmem>>, %arg11: memref<2x128x256xbf16, #tpu.memory_space<vmem>>, %arg12: memref<2x1x256xf32, #tpu.memory_space<vmem>>, %arg13: memref<2x256x128xbf16, #tpu.memory_space<vmem>>, %arg14: memref<2x1x128xf32, #tpu.memory_space<vmem>>, %arg15: memref<2x1x128xf32, #tpu.memory_space<vmem>>, %arg16: memref<2x1x128xf32, #tpu.memory_space<vmem>>, %arg17: memref<128x128xbf16, #tpu.memory_space<vmem>>, %arg18: memref<1x128xf32, #tpu.memory_space<vmem>>, %arg19: memref<1x2x128xf32, #tpu.memory_space<vmem>>) attributes {dimension_semantics = [#tpu.dimension_semantics<parallel>], iteration_bounds = array<i64: 2>, scalar_prefetch = 0 : i64, scratch_operands = 0 : i64, tpu.core_type = #tpu.core_type<tc>, window_params = [{transform_indices = @transform_0, window_bounds = array<i64: 2, 8, 128>}, {transform_indices = @transform_1, window_bounds = array<i64: 2, 1, 8>}, {pipeline_mode = #tpu.pipeline_mode<synchronous>, transform_indices = @transform_2, window_bounds = array<i64: 1, 128>}, {pipeline_mode = #tpu.pipeline_mode<synchronous>, transform_indices = @transform_3, window_bounds = array<i64: 1, 128>}, {pipeline_mode = #tpu.pipeline_mode<synchronous>, transform_indices = @transform_4, window_bounds = array<i64: 2, 128, 384>}, {pipeline_mode = #tpu.pipeline_mode<synchronous>, transform_indices = @transform_5, window_bounds = array<i64: 2, 1, 384>}, {pipeline_mode = #tpu.pipeline_mode<synchronous>, transform_indices = @transform_6, window_bounds = array<i64: 2, 128, 128>}, {pipeline_mode = #tpu.pipeline_mode<synchronous>, transform_indices = @transform_7, window_bounds = array<i64: 2, 1, 128>}, {pipeline_mode = #tpu.pipeline_mode<synchronous>, transform_indices = @transform_8, window_bounds = array<i64: 2, 1, 128>}, {pipeline_mode = #tpu.pipeline_mode<synchronous>, transform_indices = @transform_9, window_bounds = array<i64: 2, 1, 128>}, {pipeline_mode = #tpu.pipeline_mode<synchronous>, transform_indices = @transform_10, window_bounds = array<i64: 2, 128, 256>}, {pipeline_mode = #tpu.pipeline_mode<synchronous>, transform_indices = @transform_11, window_bounds = array<i64: 2, 1, 256>}, {pipeline_mode = #tpu.pipeline_mode<synchronous>, transform_indices = @transform_12, window_bounds = array<i64: 2, 256, 128>}, {pipeline_mode = #tpu.pipeline_mode<synchronous>, transform_indices = @transform_13, window_bounds = array<i64: 2, 1, 128>}, {pipeline_mode = #tpu.pipeline_mode<synchronous>, transform_indices = @transform_14, window_bounds = array<i64: 2, 1, 128>}, {pipeline_mode = #tpu.pipeline_mode<synchronous>, transform_indices = @transform_15, window_bounds = array<i64: 2, 1, 128>}, {pipeline_mode = #tpu.pipeline_mode<synchronous>, transform_indices = @transform_16, window_bounds = array<i64: 128, 128>}, {pipeline_mode = #tpu.pipeline_mode<synchronous>, transform_indices = @transform_17, window_bounds = array<i64: 1, 128>}, {transform_indices = @transform_18, window_bounds = array<i64: 1, 2, 128>}]} {
    %c0 = arith.constant 0 : index
    %c0_0 = arith.constant 0 : index
    %c0_1 = arith.constant 0 : index
    %0 = vector.load %arg1[%c0, %c0_0, %c0_1] : memref<2x8x128xf32, #tpu.memory_space<vmem>>, vector<2x8x128xf32>
    %1 = vector.shape_cast %0 : vector<2x8x128xf32> to vector<16x128xf32>
    %c0_2 = arith.constant 0 : index
    %c0_3 = arith.constant 0 : index
    %2 = vector.load %arg3[%c0_2, %c0_3] : memref<1x128xf32, #tpu.memory_space<vmem>>, vector<1x128xf32>
    %c0_4 = arith.constant 0 : index
    %c0_5 = arith.constant 0 : index
    %3 = vector.load %arg4[%c0_4, %c0_5] : memref<1x128xf32, #tpu.memory_space<vmem>>, vector<1x128xf32>
    %cst = arith.constant dense<0.000000e+00> : vector<16xf32>
    %4 = vector.multi_reduction <add>, %1, %cst [1] : vector<16x128xf32> to vector<16xf32>
    %5 = vector.shape_cast %4 : vector<16xf32> to vector<16x1xf32>
    %cst_6 = arith.constant 1.280000e+02 : f32
    %6 = vector.broadcast %cst_6 : f32 to vector<16x1xf32>
    %7 = arith.divf %5, %6 : vector<16x1xf32>
    %8 = vector.broadcast %7 : vector<16x1xf32> to vector<16x128xf32>
    %9 = arith.subf %1, %8 : vector<16x128xf32>
    %10 = arith.mulf %9, %9 : vector<16x128xf32>
    %cst_7 = arith.constant dense<0.000000e+00> : vector<16xf32>
    %11 = vector.multi_reduction <add>, %10, %cst_7 [1] : vector<16x128xf32> to vector<16xf32>
    %12 = vector.shape_cast %11 : vector<16xf32> to vector<16x1xf32>
    %cst_8 = arith.constant 1.280000e+02 : f32
    %13 = vector.broadcast %cst_8 : f32 to vector<16x1xf32>
    %14 = arith.divf %12, %13 : vector<16x1xf32>
    %15 = vector.broadcast %7 : vector<16x1xf32> to vector<16x128xf32>
    %16 = arith.subf %1, %15 : vector<16x128xf32>
    %cst_9 = arith.constant 9.99999996E-13 : f32
    %17 = vector.broadcast %cst_9 : f32 to vector<16x1xf32>
    %18 = arith.addf %14, %17 : vector<16x1xf32>
    %19 = math.rsqrt %18 : vector<16x1xf32>
    %20 = vector.broadcast %19 : vector<16x1xf32> to vector<16x128xf32>
    %21 = arith.mulf %16, %20 : vector<16x128xf32>
    %22 = vector.broadcast %2 : vector<1x128xf32> to vector<16x128xf32>
    %23 = arith.mulf %21, %22 : vector<16x128xf32>
    %24 = vector.broadcast %3 : vector<1x128xf32> to vector<16x128xf32>
    %25 = arith.addf %23, %24 : vector<16x128xf32>
    %c0_10 = arith.constant 0 : index
    %c0_11 = arith.constant 0 : index
    %c0_12 = arith.constant 0 : index
    %26 = vector.load %arg2[%c0_10, %c0_11, %c0_12] : memref<2x1x8xf32, #tpu.memory_space<vmem>>, vector<2x1x8xf32>
    %cst_13 = arith.constant 1.000000e+00 : f32
    %27 = vector.broadcast %cst_13 : f32 to vector<2x1x8xf32>
    %28 = arith.subf %27, %26 : vector<2x1x8xf32>
    %cst_14 = arith.constant -1.000000e+04 : f32
    %29 = vector.broadcast %cst_14 : f32 to vector<2x1x8xf32>
    %30 = arith.mulf %28, %29 : vector<2x1x8xf32>
    %31 = arith.truncf %25 : vector<16x128xf32> to vector<16x128xbf16>
    %c0_15 = arith.constant 0 : index
    %c0_16 = arith.constant 0 : index
    %c0_17 = arith.constant 0 : index
    %32 = vector.load %arg5[%c0_15, %c0_16, %c0_17] : memref<2x128x384xbf16, #tpu.memory_space<vmem>>, vector<1x128x384xbf16>
    %33 = vector.shape_cast %32 : vector<1x128x384xbf16> to vector<128x384xbf16>
    %cst_18 = arith.constant dense<0.000000e+00> : vector<16x384xf32>
    %34 = tpu.matmul %31, %33, %cst_18 {dimension_numbers = #tpu.dot_dimension_numbers<[1], [0], [0], [1], [0, 0, 1, 1], [], []>} : vector<16x128xbf16>, vector<128x384xbf16>, vector<16x384xf32> -> vector<16x384xf32>
    %c0_19 = arith.constant 0 : index
    %c0_20 = arith.constant 0 : index
    %c0_21 = arith.constant 0 : index
    %35 = vector.load %arg6[%c0_19, %c0_20, %c0_21] : memref<2x1x384xf32, #tpu.memory_space<vmem>>, vector<1x1x384xf32>
    %36 = vector.shape_cast %35 : vector<1x1x384xf32> to vector<1x384xf32>
    %37 = vector.broadcast %36 : vector<1x384xf32> to vector<16x384xf32>
    %38 = arith.addf %34, %37 : vector<16x384xf32>
    %39 = vector.shape_cast %38 : vector<16x384xf32> to vector<2x8x384xf32>
    %40 = vector.extract_strided_slice %39 {offsets = [0, 0, 0], sizes = [2, 8, 64], strides = [1, 1, 1]} : vector<2x8x384xf32> to vector<2x8x64xf32>
    %41 = arith.truncf %40 : vector<2x8x64xf32> to vector<2x8x64xbf16>
    %42 = vector.extract_strided_slice %39 {offsets = [0, 0, 128], sizes = [2, 8, 64], strides = [1, 1, 1]} : vector<2x8x384xf32> to vector<2x8x64xf32>
    %43 = arith.truncf %42 : vector<2x8x64xf32> to vector<2x8x64xbf16>
    %44 = vector.extract_strided_slice %39 {offsets = [0, 0, 256], sizes = [2, 8, 64], strides = [1, 1, 1]} : vector<2x8x384xf32> to vector<2x8x64xf32>
    %45 = arith.truncf %44 : vector<2x8x64xf32> to vector<2x8x64xbf16>
    %cst_22 = arith.constant dense<0.000000e+00> : vector<2x8x8xf32>
    %46 = tpu.matmul %41, %43, %cst_22 {dimension_numbers = #tpu.dot_dimension_numbers<[2], [2], [1], [1], [0, 0, 0, 1, 1, 1], [0], [0]>} : vector<2x8x64xbf16>, vector<2x8x64xbf16>, vector<2x8x8xf32> -> vector<2x8x8xf32>
    %cst_23 = arith.constant 1.250000e-01 : f32
    %47 = vector.broadcast %cst_23 : f32 to vector<2x8x8xf32>
    %48 = arith.mulf %46, %47 : vector<2x8x8xf32>
    %49 = vector.broadcast %30 : vector<2x1x8xf32> to vector<2x8x8xf32>
    %50 = arith.addf %48, %49 : vector<2x8x8xf32>
    %cst_24 = arith.constant dense<0xFF800000> : vector<2x8xf32>
    %51 = vector.multi_reduction <maximumf>, %50, %cst_24 [2] : vector<2x8x8xf32> to vector<2x8xf32>
    %52 = vector.shape_cast %51 : vector<2x8xf32> to vector<2x8x1xf32>
    %53 = vector.broadcast %52 : vector<2x8x1xf32> to vector<2x8x8xf32>
    %54 = arith.subf %50, %53 : vector<2x8x8xf32>
    %55 = math.exp %54 : vector<2x8x8xf32>
    %cst_25 = arith.constant dense<0.000000e+00> : vector<2x8xf32>
    %56 = vector.multi_reduction <add>, %55, %cst_25 [2] : vector<2x8x8xf32> to vector<2x8xf32>
    %57 = vector.shape_cast %56 : vector<2x8xf32> to vector<2x8x1xf32>
    %58 = tpu.reciprocal %57 {approx = true} : vector<2x8x1xf32> -> vector<2x8x1xf32>
    %59 = vector.broadcast %58 : vector<2x8x1xf32> to vector<2x8x8xf32>
    %60 = arith.mulf %55, %59 : vector<2x8x8xf32>
    %61 = arith.truncf %60 : vector<2x8x8xf32> to vector<2x8x8xbf16>
    %cst_26 = arith.constant dense<0.000000e+00> : vector<2x8x64xf32>
    %62 = tpu.matmul %61, %45, %cst_26 {dimension_numbers = #tpu.dot_dimension_numbers<[2], [1], [1], [2], [0, 0, 0, 1, 1, 2], [0], [0]>} : vector<2x8x8xbf16>, vector<2x8x64xbf16>, vector<2x8x64xf32> -> vector<2x8x64xf32>
    %63 = vector.extract_strided_slice %39 {offsets = [0, 0, 64], sizes = [2, 8, 64], strides = [1, 1, 1]} : vector<2x8x384xf32> to vector<2x8x64xf32>
    %64 = arith.truncf %63 : vector<2x8x64xf32> to vector<2x8x64xbf16>
    %65 = vector.extract_strided_slice %39 {offsets = [0, 0, 192], sizes = [2, 8, 64], strides = [1, 1, 1]} : vector<2x8x384xf32> to vector<2x8x64xf32>
    %66 = arith.truncf %65 : vector<2x8x64xf32> to vector<2x8x64xbf16>
    %67 = vector.extract_strided_slice %39 {offsets = [0, 0, 320], sizes = [2, 8, 64], strides = [1, 1, 1]} : vector<2x8x384xf32> to vector<2x8x64xf32>
    %68 = arith.truncf %67 : vector<2x8x64xf32> to vector<2x8x64xbf16>
    %cst_27 = arith.constant dense<0.000000e+00> : vector<2x8x8xf32>
    %69 = tpu.matmul %64, %66, %cst_27 {dimension_numbers = #tpu.dot_dimension_numbers<[2], [2], [1], [1], [0, 0, 0, 1, 1, 1], [0], [0]>} : vector<2x8x64xbf16>, vector<2x8x64xbf16>, vector<2x8x8xf32> -> vector<2x8x8xf32>
    %cst_28 = arith.constant 1.250000e-01 : f32
    %70 = vector.broadcast %cst_28 : f32 to vector<2x8x8xf32>
    %71 = arith.mulf %69, %70 : vector<2x8x8xf32>
    %72 = vector.broadcast %30 : vector<2x1x8xf32> to vector<2x8x8xf32>
    %73 = arith.addf %71, %72 : vector<2x8x8xf32>
    %cst_29 = arith.constant dense<0xFF800000> : vector<2x8xf32>
    %74 = vector.multi_reduction <maximumf>, %73, %cst_29 [2] : vector<2x8x8xf32> to vector<2x8xf32>
    %75 = vector.shape_cast %74 : vector<2x8xf32> to vector<2x8x1xf32>
    %76 = vector.broadcast %75 : vector<2x8x1xf32> to vector<2x8x8xf32>
    %77 = arith.subf %73, %76 : vector<2x8x8xf32>
    %78 = math.exp %77 : vector<2x8x8xf32>
    %cst_30 = arith.constant dense<0.000000e+00> : vector<2x8xf32>
    %79 = vector.multi_reduction <add>, %78, %cst_30 [2] : vector<2x8x8xf32> to vector<2x8xf32>
    %80 = vector.shape_cast %79 : vector<2x8xf32> to vector<2x8x1xf32>
    %81 = tpu.reciprocal %80 {approx = true} : vector<2x8x1xf32> -> vector<2x8x1xf32>
    %82 = vector.broadcast %81 : vector<2x8x1xf32> to vector<2x8x8xf32>
    %83 = arith.mulf %78, %82 : vector<2x8x8xf32>
    %84 = arith.truncf %83 : vector<2x8x8xf32> to vector<2x8x8xbf16>
    %cst_31 = arith.constant dense<0.000000e+00> : vector<2x8x64xf32>
    %85 = tpu.matmul %84, %68, %cst_31 {dimension_numbers = #tpu.dot_dimension_numbers<[2], [1], [1], [2], [0, 0, 0, 1, 1, 2], [0], [0]>} : vector<2x8x8xbf16>, vector<2x8x64xbf16>, vector<2x8x64xf32> -> vector<2x8x64xf32>
    %86 = tpu.concatenate %62, %85 in 2 : vector<2x8x64xf32>, vector<2x8x64xf32> -> vector<2x8x128xf32>
    %87 = vector.shape_cast %86 : vector<2x8x128xf32> to vector<16x128xf32>
    %88 = arith.truncf %87 : vector<16x128xf32> to vector<16x128xbf16>
    %c0_32 = arith.constant 0 : index
    %c0_33 = arith.constant 0 : index
    %c0_34 = arith.constant 0 : index
    %89 = vector.load %arg7[%c0_32, %c0_33, %c0_34] : memref<2x128x128xbf16, #tpu.memory_space<vmem>>, vector<1x128x128xbf16>
    %90 = vector.shape_cast %89 : vector<1x128x128xbf16> to vector<128x128xbf16>
    %cst_35 = arith.constant dense<0.000000e+00> : vector<16x128xf32>
    %91 = tpu.matmul %88, %90, %cst_35 {dimension_numbers = #tpu.dot_dimension_numbers<[1], [0], [0], [1], [0, 0, 1, 1], [], []>} : vector<16x128xbf16>, vector<128x128xbf16>, vector<16x128xf32> -> vector<16x128xf32>
    %c0_36 = arith.constant 0 : index
    %c0_37 = arith.constant 0 : index
    %c0_38 = arith.constant 0 : index
    %92 = vector.load %arg8[%c0_36, %c0_37, %c0_38] : memref<2x1x128xf32, #tpu.memory_space<vmem>>, vector<1x1x128xf32>
    %93 = vector.shape_cast %92 : vector<1x1x128xf32> to vector<1x128xf32>
    %94 = vector.broadcast %93 : vector<1x128xf32> to vector<16x128xf32>
    %95 = arith.addf %91, %94 : vector<16x128xf32>
    %96 = arith.addf %95, %25 : vector<16x128xf32>
    %c0_39 = arith.constant 0 : index
    %c0_40 = arith.constant 0 : index
    %c0_41 = arith.constant 0 : index
    %97 = vector.load %arg9[%c0_39, %c0_40, %c0_41] : memref<2x1x128xf32, #tpu.memory_space<vmem>>, vector<1x1x128xf32>
    %98 = vector.shape_cast %97 : vector<1x1x128xf32> to vector<1x128xf32>
    %c0_42 = arith.constant 0 : index
    %c0_43 = arith.constant 0 : index
    %c0_44 = arith.constant 0 : index
    %99 = vector.load %arg10[%c0_42, %c0_43, %c0_44] : memref<2x1x128xf32, #tpu.memory_space<vmem>>, vector<1x1x128xf32>
    %100 = vector.shape_cast %99 : vector<1x1x128xf32> to vector<1x128xf32>
    %cst_45 = arith.constant dense<0.000000e+00> : vector<16xf32>
    %101 = vector.multi_reduction <add>, %96, %cst_45 [1] : vector<16x128xf32> to vector<16xf32>
    %102 = vector.shape_cast %101 : vector<16xf32> to vector<16x1xf32>
    %cst_46 = arith.constant 1.280000e+02 : f32
    %103 = vector.broadcast %cst_46 : f32 to vector<16x1xf32>
    %104 = arith.divf %102, %103 : vector<16x1xf32>
    %105 = vector.broadcast %104 : vector<16x1xf32> to vector<16x128xf32>
    %106 = arith.subf %96, %105 : vector<16x128xf32>
    %107 = arith.mulf %106, %106 : vector<16x128xf32>
    %cst_47 = arith.constant dense<0.000000e+00> : vector<16xf32>
    %108 = vector.multi_reduction <add>, %107, %cst_47 [1] : vector<16x128xf32> to vector<16xf32>
    %109 = vector.shape_cast %108 : vector<16xf32> to vector<16x1xf32>
    %cst_48 = arith.constant 1.280000e+02 : f32
    %110 = vector.broadcast %cst_48 : f32 to vector<16x1xf32>
    %111 = arith.divf %109, %110 : vector<16x1xf32>
    %112 = vector.broadcast %104 : vector<16x1xf32> to vector<16x128xf32>
    %113 = arith.subf %96, %112 : vector<16x128xf32>
    %cst_49 = arith.constant 9.99999996E-13 : f32
    %114 = vector.broadcast %cst_49 : f32 to vector<16x1xf32>
    %115 = arith.addf %111, %114 : vector<16x1xf32>
    %116 = math.rsqrt %115 : vector<16x1xf32>
    %117 = vector.broadcast %116 : vector<16x1xf32> to vector<16x128xf32>
    %118 = arith.mulf %113, %117 : vector<16x128xf32>
    %119 = vector.broadcast %98 : vector<1x128xf32> to vector<16x128xf32>
    %120 = arith.mulf %118, %119 : vector<16x128xf32>
    %121 = vector.broadcast %100 : vector<1x128xf32> to vector<16x128xf32>
    %122 = arith.addf %120, %121 : vector<16x128xf32>
    %123 = arith.truncf %122 : vector<16x128xf32> to vector<16x128xbf16>
    %c0_50 = arith.constant 0 : index
    %c0_51 = arith.constant 0 : index
    %c0_52 = arith.constant 0 : index
    %124 = vector.load %arg11[%c0_50, %c0_51, %c0_52] : memref<2x128x256xbf16, #tpu.memory_space<vmem>>, vector<1x128x256xbf16>
    %125 = vector.shape_cast %124 : vector<1x128x256xbf16> to vector<128x256xbf16>
    %cst_53 = arith.constant dense<0.000000e+00> : vector<16x256xf32>
    %126 = tpu.matmul %123, %125, %cst_53 {dimension_numbers = #tpu.dot_dimension_numbers<[1], [0], [0], [1], [0, 0, 1, 1], [], []>} : vector<16x128xbf16>, vector<128x256xbf16>, vector<16x256xf32> -> vector<16x256xf32>
    %c0_54 = arith.constant 0 : index
    %c0_55 = arith.constant 0 : index
    %c0_56 = arith.constant 0 : index
    %127 = vector.load %arg12[%c0_54, %c0_55, %c0_56] : memref<2x1x256xf32, #tpu.memory_space<vmem>>, vector<1x1x256xf32>
    %128 = vector.shape_cast %127 : vector<1x1x256xf32> to vector<1x256xf32>
    %129 = vector.broadcast %128 : vector<1x256xf32> to vector<16x256xf32>
    %130 = arith.addf %126, %129 : vector<16x256xf32>
    %cst_57 = arith.constant 5.000000e-01 : f32
    %131 = vector.broadcast %cst_57 : f32 to vector<16x256xf32>
    %132 = arith.mulf %131, %130 : vector<16x256xf32>
    %cst_58 = arith.constant 4.471500e-02 : f32
    %133 = vector.broadcast %cst_58 : f32 to vector<16x256xf32>
    %134 = arith.mulf %133, %130 : vector<16x256xf32>
    %135 = arith.mulf %134, %130 : vector<16x256xf32>
    %136 = arith.mulf %135, %130 : vector<16x256xf32>
    %137 = arith.addf %130, %136 : vector<16x256xf32>
    %cst_59 = arith.constant 0.797884583 : f32
    %138 = vector.broadcast %cst_59 : f32 to vector<16x256xf32>
    %139 = arith.mulf %138, %137 : vector<16x256xf32>
    %140 = math.tanh %139 : vector<16x256xf32>
    %cst_60 = arith.constant 1.000000e+00 : f32
    %141 = vector.broadcast %cst_60 : f32 to vector<16x256xf32>
    %142 = arith.addf %141, %140 : vector<16x256xf32>
    %143 = arith.mulf %132, %142 : vector<16x256xf32>
    %144 = arith.truncf %143 : vector<16x256xf32> to vector<16x256xbf16>
    %c0_61 = arith.constant 0 : index
    %c0_62 = arith.constant 0 : index
    %c0_63 = arith.constant 0 : index
    %145 = vector.load %arg13[%c0_61, %c0_62, %c0_63] : memref<2x256x128xbf16, #tpu.memory_space<vmem>>, vector<1x256x128xbf16>
    %146 = vector.shape_cast %145 : vector<1x256x128xbf16> to vector<256x128xbf16>
    %cst_64 = arith.constant dense<0.000000e+00> : vector<16x128xf32>
    %147 = tpu.matmul %144, %146, %cst_64 {dimension_numbers = #tpu.dot_dimension_numbers<[1], [0], [0], [1], [0, 0, 1, 1], [], []>} : vector<16x256xbf16>, vector<256x128xbf16>, vector<16x128xf32> -> vector<16x128xf32>
    %c0_65 = arith.constant 0 : index
    %c0_66 = arith.constant 0 : index
    %c0_67 = arith.constant 0 : index
    %148 = vector.load %arg14[%c0_65, %c0_66, %c0_67] : memref<2x1x128xf32, #tpu.memory_space<vmem>>, vector<1x1x128xf32>
    %149 = vector.shape_cast %148 : vector<1x1x128xf32> to vector<1x128xf32>
    %150 = vector.broadcast %149 : vector<1x128xf32> to vector<16x128xf32>
    %151 = arith.addf %147, %150 : vector<16x128xf32>
    %152 = arith.addf %151, %122 : vector<16x128xf32>
    %c0_68 = arith.constant 0 : index
    %c0_69 = arith.constant 0 : index
    %c0_70 = arith.constant 0 : index
    %153 = vector.load %arg15[%c0_68, %c0_69, %c0_70] : memref<2x1x128xf32, #tpu.memory_space<vmem>>, vector<1x1x128xf32>
    %154 = vector.shape_cast %153 : vector<1x1x128xf32> to vector<1x128xf32>
    %c0_71 = arith.constant 0 : index
    %c0_72 = arith.constant 0 : index
    %c0_73 = arith.constant 0 : index
    %155 = vector.load %arg16[%c0_71, %c0_72, %c0_73] : memref<2x1x128xf32, #tpu.memory_space<vmem>>, vector<1x1x128xf32>
    %156 = vector.shape_cast %155 : vector<1x1x128xf32> to vector<1x128xf32>
    %cst_74 = arith.constant dense<0.000000e+00> : vector<16xf32>
    %157 = vector.multi_reduction <add>, %152, %cst_74 [1] : vector<16x128xf32> to vector<16xf32>
    %158 = vector.shape_cast %157 : vector<16xf32> to vector<16x1xf32>
    %cst_75 = arith.constant 1.280000e+02 : f32
    %159 = vector.broadcast %cst_75 : f32 to vector<16x1xf32>
    %160 = arith.divf %158, %159 : vector<16x1xf32>
    %161 = vector.broadcast %160 : vector<16x1xf32> to vector<16x128xf32>
    %162 = arith.subf %152, %161 : vector<16x128xf32>
    %163 = arith.mulf %162, %162 : vector<16x128xf32>
    %cst_76 = arith.constant dense<0.000000e+00> : vector<16xf32>
    %164 = vector.multi_reduction <add>, %163, %cst_76 [1] : vector<16x128xf32> to vector<16xf32>
    %165 = vector.shape_cast %164 : vector<16xf32> to vector<16x1xf32>
    %cst_77 = arith.constant 1.280000e+02 : f32
    %166 = vector.broadcast %cst_77 : f32 to vector<16x1xf32>
    %167 = arith.divf %165, %166 : vector<16x1xf32>
    %168 = vector.broadcast %160 : vector<16x1xf32> to vector<16x128xf32>
    %169 = arith.subf %152, %168 : vector<16x128xf32>
    %cst_78 = arith.constant 9.99999996E-13 : f32
    %170 = vector.broadcast %cst_78 : f32 to vector<16x1xf32>
    %171 = arith.addf %167, %170 : vector<16x1xf32>
    %172 = math.rsqrt %171 : vector<16x1xf32>
    %173 = vector.broadcast %172 : vector<16x1xf32> to vector<16x128xf32>
    %174 = arith.mulf %169, %173 : vector<16x128xf32>
    %175 = vector.broadcast %154 : vector<1x128xf32> to vector<16x128xf32>
    %176 = arith.mulf %174, %175 : vector<16x128xf32>
    %177 = vector.broadcast %156 : vector<1x128xf32> to vector<16x128xf32>
    %178 = arith.addf %176, %177 : vector<16x128xf32>
    %179 = arith.truncf %178 : vector<16x128xf32> to vector<16x128xbf16>
    %c1 = arith.constant 1 : index
    %c0_79 = arith.constant 0 : index
    %c0_80 = arith.constant 0 : index
    %180 = vector.load %arg5[%c1, %c0_79, %c0_80] : memref<2x128x384xbf16, #tpu.memory_space<vmem>>, vector<1x128x384xbf16>
    %181 = vector.shape_cast %180 : vector<1x128x384xbf16> to vector<128x384xbf16>
    %cst_81 = arith.constant dense<0.000000e+00> : vector<16x384xf32>
    %182 = tpu.matmul %179, %181, %cst_81 {dimension_numbers = #tpu.dot_dimension_numbers<[1], [0], [0], [1], [0, 0, 1, 1], [], []>} : vector<16x128xbf16>, vector<128x384xbf16>, vector<16x384xf32> -> vector<16x384xf32>
    %c1_82 = arith.constant 1 : index
    %c0_83 = arith.constant 0 : index
    %c0_84 = arith.constant 0 : index
    %183 = vector.load %arg6[%c1_82, %c0_83, %c0_84] : memref<2x1x384xf32, #tpu.memory_space<vmem>>, vector<1x1x384xf32>
    %184 = vector.shape_cast %183 : vector<1x1x384xf32> to vector<1x384xf32>
    %185 = vector.broadcast %184 : vector<1x384xf32> to vector<16x384xf32>
    %186 = arith.addf %182, %185 : vector<16x384xf32>
    %187 = vector.shape_cast %186 : vector<16x384xf32> to vector<2x8x384xf32>
    %188 = vector.extract_strided_slice %187 {offsets = [0, 0, 0], sizes = [2, 8, 64], strides = [1, 1, 1]} : vector<2x8x384xf32> to vector<2x8x64xf32>
    %189 = arith.truncf %188 : vector<2x8x64xf32> to vector<2x8x64xbf16>
    %190 = vector.extract_strided_slice %187 {offsets = [0, 0, 128], sizes = [2, 8, 64], strides = [1, 1, 1]} : vector<2x8x384xf32> to vector<2x8x64xf32>
    %191 = arith.truncf %190 : vector<2x8x64xf32> to vector<2x8x64xbf16>
    %192 = vector.extract_strided_slice %187 {offsets = [0, 0, 256], sizes = [2, 8, 64], strides = [1, 1, 1]} : vector<2x8x384xf32> to vector<2x8x64xf32>
    %193 = arith.truncf %192 : vector<2x8x64xf32> to vector<2x8x64xbf16>
    %cst_85 = arith.constant dense<0.000000e+00> : vector<2x8x8xf32>
    %194 = tpu.matmul %189, %191, %cst_85 {dimension_numbers = #tpu.dot_dimension_numbers<[2], [2], [1], [1], [0, 0, 0, 1, 1, 1], [0], [0]>} : vector<2x8x64xbf16>, vector<2x8x64xbf16>, vector<2x8x8xf32> -> vector<2x8x8xf32>
    %cst_86 = arith.constant 1.250000e-01 : f32
    %195 = vector.broadcast %cst_86 : f32 to vector<2x8x8xf32>
    %196 = arith.mulf %194, %195 : vector<2x8x8xf32>
    %197 = vector.broadcast %30 : vector<2x1x8xf32> to vector<2x8x8xf32>
    %198 = arith.addf %196, %197 : vector<2x8x8xf32>
    %cst_87 = arith.constant dense<0xFF800000> : vector<2x8xf32>
    %199 = vector.multi_reduction <maximumf>, %198, %cst_87 [2] : vector<2x8x8xf32> to vector<2x8xf32>
    %200 = vector.shape_cast %199 : vector<2x8xf32> to vector<2x8x1xf32>
    %201 = vector.broadcast %200 : vector<2x8x1xf32> to vector<2x8x8xf32>
    %202 = arith.subf %198, %201 : vector<2x8x8xf32>
    %203 = math.exp %202 : vector<2x8x8xf32>
    %cst_88 = arith.constant dense<0.000000e+00> : vector<2x8xf32>
    %204 = vector.multi_reduction <add>, %203, %cst_88 [2] : vector<2x8x8xf32> to vector<2x8xf32>
    %205 = vector.shape_cast %204 : vector<2x8xf32> to vector<2x8x1xf32>
    %206 = tpu.reciprocal %205 {approx = true} : vector<2x8x1xf32> -> vector<2x8x1xf32>
    %207 = vector.broadcast %206 : vector<2x8x1xf32> to vector<2x8x8xf32>
    %208 = arith.mulf %203, %207 : vector<2x8x8xf32>
    %209 = arith.truncf %208 : vector<2x8x8xf32> to vector<2x8x8xbf16>
    %cst_89 = arith.constant dense<0.000000e+00> : vector<2x8x64xf32>
    %210 = tpu.matmul %209, %193, %cst_89 {dimension_numbers = #tpu.dot_dimension_numbers<[2], [1], [1], [2], [0, 0, 0, 1, 1, 2], [0], [0]>} : vector<2x8x8xbf16>, vector<2x8x64xbf16>, vector<2x8x64xf32> -> vector<2x8x64xf32>
    %211 = vector.extract_strided_slice %187 {offsets = [0, 0, 64], sizes = [2, 8, 64], strides = [1, 1, 1]} : vector<2x8x384xf32> to vector<2x8x64xf32>
    %212 = arith.truncf %211 : vector<2x8x64xf32> to vector<2x8x64xbf16>
    %213 = vector.extract_strided_slice %187 {offsets = [0, 0, 192], sizes = [2, 8, 64], strides = [1, 1, 1]} : vector<2x8x384xf32> to vector<2x8x64xf32>
    %214 = arith.truncf %213 : vector<2x8x64xf32> to vector<2x8x64xbf16>
    %215 = vector.extract_strided_slice %187 {offsets = [0, 0, 320], sizes = [2, 8, 64], strides = [1, 1, 1]} : vector<2x8x384xf32> to vector<2x8x64xf32>
    %216 = arith.truncf %215 : vector<2x8x64xf32> to vector<2x8x64xbf16>
    %cst_90 = arith.constant dense<0.000000e+00> : vector<2x8x8xf32>
    %217 = tpu.matmul %212, %214, %cst_90 {dimension_numbers = #tpu.dot_dimension_numbers<[2], [2], [1], [1], [0, 0, 0, 1, 1, 1], [0], [0]>} : vector<2x8x64xbf16>, vector<2x8x64xbf16>, vector<2x8x8xf32> -> vector<2x8x8xf32>
    %cst_91 = arith.constant 1.250000e-01 : f32
    %218 = vector.broadcast %cst_91 : f32 to vector<2x8x8xf32>
    %219 = arith.mulf %217, %218 : vector<2x8x8xf32>
    %220 = vector.broadcast %30 : vector<2x1x8xf32> to vector<2x8x8xf32>
    %221 = arith.addf %219, %220 : vector<2x8x8xf32>
    %cst_92 = arith.constant dense<0xFF800000> : vector<2x8xf32>
    %222 = vector.multi_reduction <maximumf>, %221, %cst_92 [2] : vector<2x8x8xf32> to vector<2x8xf32>
    %223 = vector.shape_cast %222 : vector<2x8xf32> to vector<2x8x1xf32>
    %224 = vector.broadcast %223 : vector<2x8x1xf32> to vector<2x8x8xf32>
    %225 = arith.subf %221, %224 : vector<2x8x8xf32>
    %226 = math.exp %225 : vector<2x8x8xf32>
    %cst_93 = arith.constant dense<0.000000e+00> : vector<2x8xf32>
    %227 = vector.multi_reduction <add>, %226, %cst_93 [2] : vector<2x8x8xf32> to vector<2x8xf32>
    %228 = vector.shape_cast %227 : vector<2x8xf32> to vector<2x8x1xf32>
    %229 = tpu.reciprocal %228 {approx = true} : vector<2x8x1xf32> -> vector<2x8x1xf32>
    %230 = vector.broadcast %229 : vector<2x8x1xf32> to vector<2x8x8xf32>
    %231 = arith.mulf %226, %230 : vector<2x8x8xf32>
    %232 = arith.truncf %231 : vector<2x8x8xf32> to vector<2x8x8xbf16>
    %cst_94 = arith.constant dense<0.000000e+00> : vector<2x8x64xf32>
    %233 = tpu.matmul %232, %216, %cst_94 {dimension_numbers = #tpu.dot_dimension_numbers<[2], [1], [1], [2], [0, 0, 0, 1, 1, 2], [0], [0]>} : vector<2x8x8xbf16>, vector<2x8x64xbf16>, vector<2x8x64xf32> -> vector<2x8x64xf32>
    %234 = tpu.concatenate %210, %233 in 2 : vector<2x8x64xf32>, vector<2x8x64xf32> -> vector<2x8x128xf32>
    %235 = vector.shape_cast %234 : vector<2x8x128xf32> to vector<16x128xf32>
    %236 = arith.truncf %235 : vector<16x128xf32> to vector<16x128xbf16>
    %c1_95 = arith.constant 1 : index
    %c0_96 = arith.constant 0 : index
    %c0_97 = arith.constant 0 : index
    %237 = vector.load %arg7[%c1_95, %c0_96, %c0_97] : memref<2x128x128xbf16, #tpu.memory_space<vmem>>, vector<1x128x128xbf16>
    %238 = vector.shape_cast %237 : vector<1x128x128xbf16> to vector<128x128xbf16>
    %cst_98 = arith.constant dense<0.000000e+00> : vector<16x128xf32>
    %239 = tpu.matmul %236, %238, %cst_98 {dimension_numbers = #tpu.dot_dimension_numbers<[1], [0], [0], [1], [0, 0, 1, 1], [], []>} : vector<16x128xbf16>, vector<128x128xbf16>, vector<16x128xf32> -> vector<16x128xf32>
    %c1_99 = arith.constant 1 : index
    %c0_100 = arith.constant 0 : index
    %c0_101 = arith.constant 0 : index
    %240 = vector.load %arg8[%c1_99, %c0_100, %c0_101] : memref<2x1x128xf32, #tpu.memory_space<vmem>>, vector<1x1x128xf32>
    %241 = vector.shape_cast %240 : vector<1x1x128xf32> to vector<1x128xf32>
    %242 = vector.broadcast %241 : vector<1x128xf32> to vector<16x128xf32>
    %243 = arith.addf %239, %242 : vector<16x128xf32>
    %244 = arith.addf %243, %178 : vector<16x128xf32>
    %c1_102 = arith.constant 1 : index
    %c0_103 = arith.constant 0 : index
    %c0_104 = arith.constant 0 : index
    %245 = vector.load %arg9[%c1_102, %c0_103, %c0_104] : memref<2x1x128xf32, #tpu.memory_space<vmem>>, vector<1x1x128xf32>
    %246 = vector.shape_cast %245 : vector<1x1x128xf32> to vector<1x128xf32>
    %c1_105 = arith.constant 1 : index
    %c0_106 = arith.constant 0 : index
    %c0_107 = arith.constant 0 : index
    %247 = vector.load %arg10[%c1_105, %c0_106, %c0_107] : memref<2x1x128xf32, #tpu.memory_space<vmem>>, vector<1x1x128xf32>
    %248 = vector.shape_cast %247 : vector<1x1x128xf32> to vector<1x128xf32>
    %cst_108 = arith.constant dense<0.000000e+00> : vector<16xf32>
    %249 = vector.multi_reduction <add>, %244, %cst_108 [1] : vector<16x128xf32> to vector<16xf32>
    %250 = vector.shape_cast %249 : vector<16xf32> to vector<16x1xf32>
    %cst_109 = arith.constant 1.280000e+02 : f32
    %251 = vector.broadcast %cst_109 : f32 to vector<16x1xf32>
    %252 = arith.divf %250, %251 : vector<16x1xf32>
    %253 = vector.broadcast %252 : vector<16x1xf32> to vector<16x128xf32>
    %254 = arith.subf %244, %253 : vector<16x128xf32>
    %255 = arith.mulf %254, %254 : vector<16x128xf32>
    %cst_110 = arith.constant dense<0.000000e+00> : vector<16xf32>
    %256 = vector.multi_reduction <add>, %255, %cst_110 [1] : vector<16x128xf32> to vector<16xf32>
    %257 = vector.shape_cast %256 : vector<16xf32> to vector<16x1xf32>
    %cst_111 = arith.constant 1.280000e+02 : f32
    %258 = vector.broadcast %cst_111 : f32 to vector<16x1xf32>
    %259 = arith.divf %257, %258 : vector<16x1xf32>
    %260 = vector.broadcast %252 : vector<16x1xf32> to vector<16x128xf32>
    %261 = arith.subf %244, %260 : vector<16x128xf32>
    %cst_112 = arith.constant 9.99999996E-13 : f32
    %262 = vector.broadcast %cst_112 : f32 to vector<16x1xf32>
    %263 = arith.addf %259, %262 : vector<16x1xf32>
    %264 = math.rsqrt %263 : vector<16x1xf32>
    %265 = vector.broadcast %264 : vector<16x1xf32> to vector<16x128xf32>
    %266 = arith.mulf %261, %265 : vector<16x128xf32>
    %267 = vector.broadcast %246 : vector<1x128xf32> to vector<16x128xf32>
    %268 = arith.mulf %266, %267 : vector<16x128xf32>
    %269 = vector.broadcast %248 : vector<1x128xf32> to vector<16x128xf32>
    %270 = arith.addf %268, %269 : vector<16x128xf32>
    %271 = arith.truncf %270 : vector<16x128xf32> to vector<16x128xbf16>
    %c1_113 = arith.constant 1 : index
    %c0_114 = arith.constant 0 : index
    %c0_115 = arith.constant 0 : index
    %272 = vector.load %arg11[%c1_113, %c0_114, %c0_115] : memref<2x128x256xbf16, #tpu.memory_space<vmem>>, vector<1x128x256xbf16>
    %273 = vector.shape_cast %272 : vector<1x128x256xbf16> to vector<128x256xbf16>
    %cst_116 = arith.constant dense<0.000000e+00> : vector<16x256xf32>
    %274 = tpu.matmul %271, %273, %cst_116 {dimension_numbers = #tpu.dot_dimension_numbers<[1], [0], [0], [1], [0, 0, 1, 1], [], []>} : vector<16x128xbf16>, vector<128x256xbf16>, vector<16x256xf32> -> vector<16x256xf32>
    %c1_117 = arith.constant 1 : index
    %c0_118 = arith.constant 0 : index
    %c0_119 = arith.constant 0 : index
    %275 = vector.load %arg12[%c1_117, %c0_118, %c0_119] : memref<2x1x256xf32, #tpu.memory_space<vmem>>, vector<1x1x256xf32>
    %276 = vector.shape_cast %275 : vector<1x1x256xf32> to vector<1x256xf32>
    %277 = vector.broadcast %276 : vector<1x256xf32> to vector<16x256xf32>
    %278 = arith.addf %274, %277 : vector<16x256xf32>
    %cst_120 = arith.constant 5.000000e-01 : f32
    %279 = vector.broadcast %cst_120 : f32 to vector<16x256xf32>
    %280 = arith.mulf %279, %278 : vector<16x256xf32>
    %cst_121 = arith.constant 4.471500e-02 : f32
    %281 = vector.broadcast %cst_121 : f32 to vector<16x256xf32>
    %282 = arith.mulf %281, %278 : vector<16x256xf32>
    %283 = arith.mulf %282, %278 : vector<16x256xf32>
    %284 = arith.mulf %283, %278 : vector<16x256xf32>
    %285 = arith.addf %278, %284 : vector<16x256xf32>
    %cst_122 = arith.constant 0.797884583 : f32
    %286 = vector.broadcast %cst_122 : f32 to vector<16x256xf32>
    %287 = arith.mulf %286, %285 : vector<16x256xf32>
    %288 = math.tanh %287 : vector<16x256xf32>
    %cst_123 = arith.constant 1.000000e+00 : f32
    %289 = vector.broadcast %cst_123 : f32 to vector<16x256xf32>
    %290 = arith.addf %289, %288 : vector<16x256xf32>
    %291 = arith.mulf %280, %290 : vector<16x256xf32>
    %292 = arith.truncf %291 : vector<16x256xf32> to vector<16x256xbf16>
    %c1_124 = arith.constant 1 : index
    %c0_125 = arith.constant 0 : index
    %c0_126 = arith.constant 0 : index
    %293 = vector.load %arg13[%c1_124, %c0_125, %c0_126] : memref<2x256x128xbf16, #tpu.memory_space<vmem>>, vector<1x256x128xbf16>
    %294 = vector.shape_cast %293 : vector<1x256x128xbf16> to vector<256x128xbf16>
    %cst_127 = arith.constant dense<0.000000e+00> : vector<16x128xf32>
    %295 = tpu.matmul %292, %294, %cst_127 {dimension_numbers = #tpu.dot_dimension_numbers<[1], [0], [0], [1], [0, 0, 1, 1], [], []>} : vector<16x256xbf16>, vector<256x128xbf16>, vector<16x128xf32> -> vector<16x128xf32>
    %c1_128 = arith.constant 1 : index
    %c0_129 = arith.constant 0 : index
    %c0_130 = arith.constant 0 : index
    %296 = vector.load %arg14[%c1_128, %c0_129, %c0_130] : memref<2x1x128xf32, #tpu.memory_space<vmem>>, vector<1x1x128xf32>
    %297 = vector.shape_cast %296 : vector<1x1x128xf32> to vector<1x128xf32>
    %298 = vector.broadcast %297 : vector<1x128xf32> to vector<16x128xf32>
    %299 = arith.addf %295, %298 : vector<16x128xf32>
    %300 = arith.addf %299, %270 : vector<16x128xf32>
    %c1_131 = arith.constant 1 : index
    %c0_132 = arith.constant 0 : index
    %c0_133 = arith.constant 0 : index
    %301 = vector.load %arg15[%c1_131, %c0_132, %c0_133] : memref<2x1x128xf32, #tpu.memory_space<vmem>>, vector<1x1x128xf32>
    %302 = vector.shape_cast %301 : vector<1x1x128xf32> to vector<1x128xf32>
    %c1_134 = arith.constant 1 : index
    %c0_135 = arith.constant 0 : index
    %c0_136 = arith.constant 0 : index
    %303 = vector.load %arg16[%c1_134, %c0_135, %c0_136] : memref<2x1x128xf32, #tpu.memory_space<vmem>>, vector<1x1x128xf32>
    %304 = vector.shape_cast %303 : vector<1x1x128xf32> to vector<1x128xf32>
    %cst_137 = arith.constant dense<0.000000e+00> : vector<16xf32>
    %305 = vector.multi_reduction <add>, %300, %cst_137 [1] : vector<16x128xf32> to vector<16xf32>
    %306 = vector.shape_cast %305 : vector<16xf32> to vector<16x1xf32>
    %cst_138 = arith.constant 1.280000e+02 : f32
    %307 = vector.broadcast %cst_138 : f32 to vector<16x1xf32>
    %308 = arith.divf %306, %307 : vector<16x1xf32>
    %309 = vector.broadcast %308 : vector<16x1xf32> to vector<16x128xf32>
    %310 = arith.subf %300, %309 : vector<16x128xf32>
    %311 = arith.mulf %310, %310 : vector<16x128xf32>
    %cst_139 = arith.constant dense<0.000000e+00> : vector<16xf32>
    %312 = vector.multi_reduction <add>, %311, %cst_139 [1] : vector<16x128xf32> to vector<16xf32>
    %313 = vector.shape_cast %312 : vector<16xf32> to vector<16x1xf32>
    %cst_140 = arith.constant 1.280000e+02 : f32
    %314 = vector.broadcast %cst_140 : f32 to vector<16x1xf32>
    %315 = arith.divf %313, %314 : vector<16x1xf32>
    %316 = vector.broadcast %308 : vector<16x1xf32> to vector<16x128xf32>
    %317 = arith.subf %300, %316 : vector<16x128xf32>
    %cst_141 = arith.constant 9.99999996E-13 : f32
    %318 = vector.broadcast %cst_141 : f32 to vector<16x1xf32>
    %319 = arith.addf %315, %318 : vector<16x1xf32>
    %320 = math.rsqrt %319 : vector<16x1xf32>
    %321 = vector.broadcast %320 : vector<16x1xf32> to vector<16x128xf32>
    %322 = arith.mulf %317, %321 : vector<16x128xf32>
    %323 = vector.broadcast %302 : vector<1x128xf32> to vector<16x128xf32>
    %324 = arith.mulf %322, %323 : vector<16x128xf32>
    %325 = vector.broadcast %304 : vector<1x128xf32> to vector<16x128xf32>
    %326 = arith.addf %324, %325 : vector<16x128xf32>
    %327 = vector.shape_cast %326 : vector<16x128xf32> to vector<2x8x128xf32>
    %328 = vector.extract_strided_slice %327 {offsets = [0, 0, 0], sizes = [2, 1, 128], strides = [1, 1, 1]} : vector<2x8x128xf32> to vector<2x1x128xf32>
    %329 = vector.shape_cast %328 : vector<2x1x128xf32> to vector<2x128xf32>
    %330 = arith.truncf %329 : vector<2x128xf32> to vector<2x128xbf16>
    %c0_142 = arith.constant 0 : index
    %c0_143 = arith.constant 0 : index
    %331 = vector.load %arg17[%c0_142, %c0_143] : memref<128x128xbf16, #tpu.memory_space<vmem>>, vector<128x128xbf16>
    %cst_144 = arith.constant dense<0.000000e+00> : vector<2x128xf32>
    %332 = tpu.matmul %330, %331, %cst_144 {dimension_numbers = #tpu.dot_dimension_numbers<[1], [0], [0], [1], [0, 0, 1, 1], [], []>} : vector<2x128xbf16>, vector<128x128xbf16>, vector<2x128xf32> -> vector<2x128xf32>
    %c0_145 = arith.constant 0 : index
    %c0_146 = arith.constant 0 : index
    %333 = vector.load %arg18[%c0_145, %c0_146] : memref<1x128xf32, #tpu.memory_space<vmem>>, vector<1x128xf32>
    %334 = vector.broadcast %333 : vector<1x128xf32> to vector<2x128xf32>
    %335 = arith.addf %332, %334 : vector<2x128xf32>
    %336 = math.tanh %335 : vector<2x128xf32>
    %c0_147 = arith.constant 0 : index
    %c0_148 = arith.constant 0 : index
    %c0_149 = arith.constant 0 : index
    %337 = vector.load %arg19[%c0_147, %c0_148, %c0_149] : memref<1x2x128xf32, #tpu.memory_space<vmem>>, vector<1x2x128xf32>
    %338 = vector.shape_cast %337 : vector<1x2x128xf32> to vector<2x128xf32>
    %339 = vector.shape_cast %336 : vector<2x128xf32> to vector<1x2x128xf32>
    tpu.vector_store %arg19[%c0_147, %c0_148, %c0_149], %339 {strides = array<i32>} : memref<1x2x128xf32, #tpu.memory_space<vmem>>, vector<1x2x128xf32>,
    return
  }
  func.func @transform_0(%arg0: i32) -> (i32, i32, i32) {
    %c0_i32 = arith.constant 0 : i32
    %c0_i32_0 = arith.constant 0 : i32
    %c0_i32_1 = arith.constant 0 : i32
    return %arg0, %c0_i32, %c0_i32_0 : i32, i32, i32
  }
  func.func @transform_1(%arg0: i32) -> (i32, i32, i32) {
    %c0_i32 = arith.constant 0 : i32
    %c0_i32_0 = arith.constant 0 : i32
    %c0_i32_1 = arith.constant 0 : i32
    return %arg0, %c0_i32, %c0_i32_0 : i32, i32, i32
  }
  func.func @transform_2(%arg0: i32) -> (i32, i32) {
    %c0_i32 = arith.constant 0 : i32
    %c0_i32_0 = arith.constant 0 : i32
    %c0_i32_1 = arith.constant 0 : i32
    return %c0_i32, %c0_i32_0 : i32, i32
  }
  func.func @transform_3(%arg0: i32) -> (i32, i32) {
    %c0_i32 = arith.constant 0 : i32
    %c0_i32_0 = arith.constant 0 : i32
    %c0_i32_1 = arith.constant 0 : i32
    return %c0_i32, %c0_i32_0 : i32, i32
  }
  func.func @transform_4(%arg0: i32) -> (i32, i32, i32) {
    %c0_i32 = arith.constant 0 : i32
    %c0_i32_0 = arith.constant 0 : i32
    %c0_i32_1 = arith.constant 0 : i32
    %c0_i32_2 = arith.constant 0 : i32
    return %c0_i32, %c0_i32_0, %c0_i32_1 : i32, i32, i32
  }
  func.func @transform_5(%arg0: i32) -> (i32, i32, i32) {
    %c0_i32 = arith.constant 0 : i32
    %c0_i32_0 = arith.constant 0 : i32
    %c0_i32_1 = arith.constant 0 : i32
    %c0_i32_2 = arith.constant 0 : i32
    return %c0_i32, %c0_i32_0, %c0_i32_1 : i32, i32, i32
  }
  func.func @transform_6(%arg0: i32) -> (i32, i32, i32) {
    %c0_i32 = arith.constant 0 : i32
    %c0_i32_0 = arith.constant 0 : i32
    %c0_i32_1 = arith.constant 0 : i32
    %c0_i32_2 = arith.constant 0 : i32
    return %c0_i32, %c0_i32_0, %c0_i32_1 : i32, i32, i32
  }
  func.func @transform_7(%arg0: i32) -> (i32, i32, i32) {
    %c0_i32 = arith.constant 0 : i32
    %c0_i32_0 = arith.constant 0 : i32
    %c0_i32_1 = arith.constant 0 : i32
    %c0_i32_2 = arith.constant 0 : i32
    return %c0_i32, %c0_i32_0, %c0_i32_1 : i32, i32, i32
  }
  func.func @transform_8(%arg0: i32) -> (i32, i32, i32) {
    %c0_i32 = arith.constant 0 : i32
    %c0_i32_0 = arith.constant 0 : i32
    %c0_i32_1 = arith.constant 0 : i32
    %c0_i32_2 = arith.constant 0 : i32
    return %c0_i32, %c0_i32_0, %c0_i32_1 : i32, i32, i32
  }
  func.func @transform_9(%arg0: i32) -> (i32, i32, i32) {
    %c0_i32 = arith.constant 0 : i32
    %c0_i32_0 = arith.constant 0 : i32
    %c0_i32_1 = arith.constant 0 : i32
    %c0_i32_2 = arith.constant 0 : i32
    return %c0_i32, %c0_i32_0, %c0_i32_1 : i32, i32, i32
  }
  func.func @transform_10(%arg0: i32) -> (i32, i32, i32) {
    %c0_i32 = arith.constant 0 : i32
    %c0_i32_0 = arith.constant 0 : i32
    %c0_i32_1 = arith.constant 0 : i32
    %c0_i32_2 = arith.constant 0 : i32
    return %c0_i32, %c0_i32_0, %c0_i32_1 : i32, i32, i32
  }
  func.func @transform_11(%arg0: i32) -> (i32, i32, i32) {
    %c0_i32 = arith.constant 0 : i32
    %c0_i32_0 = arith.constant 0 : i32
    %c0_i32_1 = arith.constant 0 : i32
    %c0_i32_2 = arith.constant 0 : i32
    return %c0_i32, %c0_i32_0, %c0_i32_1 : i32, i32, i32
  }
  func.func @transform_12(%arg0: i32) -> (i32, i32, i32) {
    %c0_i32 = arith.constant 0 : i32
    %c0_i32_0 = arith.constant 0 : i32
    %c0_i32_1 = arith.constant 0 : i32
    %c0_i32_2 = arith.constant 0 : i32
    return %c0_i32, %c0_i32_0, %c0_i32_1 : i32, i32, i32
  }
  func.func @transform_13(%arg0: i32) -> (i32, i32, i32) {
    %c0_i32 = arith.constant 0 : i32
    %c0_i32_0 = arith.constant 0 : i32
    %c0_i32_1 = arith.constant 0 : i32
    %c0_i32_2 = arith.constant 0 : i32
    return %c0_i32, %c0_i32_0, %c0_i32_1 : i32, i32, i32
  }
  func.func @transform_14(%arg0: i32) -> (i32, i32, i32) {
    %c0_i32 = arith.constant 0 : i32
    %c0_i32_0 = arith.constant 0 : i32
    %c0_i32_1 = arith.constant 0 : i32
    %c0_i32_2 = arith.constant 0 : i32
    return %c0_i32, %c0_i32_0, %c0_i32_1 : i32, i32, i32
  }
  func.func @transform_15(%arg0: i32) -> (i32, i32, i32) {
    %c0_i32 = arith.constant 0 : i32
    %c0_i32_0 = arith.constant 0 : i32
    %c0_i32_1 = arith.constant 0 : i32
    %c0_i32_2 = arith.constant 0 : i32
    return %c0_i32, %c0_i32_0, %c0_i32_1 : i32, i32, i32
  }
  func.func @transform_16(%arg0: i32) -> (i32, i32) {
    %c0_i32 = arith.constant 0 : i32
    %c0_i32_0 = arith.constant 0 : i32
    %c0_i32_1 = arith.constant 0 : i32
    return %c0_i32, %c0_i32_0 : i32, i32
  }
  func.func @transform_17(%arg0: i32) -> (i32, i32) {
    %c0_i32 = arith.constant 0 : i32
    %c0_i32_0 = arith.constant 0 : i32
    %c0_i32_1 = arith.constant 0 : i32
    return %c0_i32, %c0_i32_0 : i32, i32
  }
  func.func @transform_18(%arg0: i32) -> (i32, i32, i32) {
    %c0_i32 = arith.constant 0 : i32
    %c0_i32_0 = arith.constant 0 : i32
    %c0_i32_1 = arith.constant 0 : i32
    return %arg0, %c0_i32, %c0_i32_0 : i32, i32, i32
  }
}

</mosaic_0001>

<bundles_post_ra>
// kernel: predict_sentiment.1
= control target key start
LH: loop header
LB: loop body
LE: loop exit
PB: predicated region body
PF: predicated region fallthrough
CT: control target
= control target key end

     0   :  { %s4511_s0 = inlined_call_operand.vmem [shape: f32[4,8,128], index: 0, kind: input, shape index: {}]   ;;  %s4512_s1 = inlined_call_operand.vmem [shape: f32[4,1,8], index: 1, kind: input, shape index: {}]   ;;  %s4513_s2 = inlined_call_operand.vmem [shape: f32[1,128], index: 2, kind: input, shape index: {}]   ;;  %s4514_s3 = inlined_call_operand.vmem [shape: f32[1,128], index: 3, kind: input, shape index: {}]   ;;  %s4515_s4 = inlined_call_operand.hbm [shape: bf16[2,128,384], index: 4, kind: input, shape index: {}]   ;;  %s4516_s5 = inlined_call_operand.vmem [shape: f32[2,1,384], index: 5, kind: input, shape index: {}]   ;;  %s4517_s6 = inlined_call_operand.hbm [shape: bf16[2,128,128], index: 6, kind: input, shape index: {}]   ;;  %s4518_s7 = inlined_call_operand.vmem [shape: f32[2,1,128], index: 7, kind: input, shape index: {}]   ;;  %s4519_s8 = inlined_call_operand.vmem [shape: f32[2,1,128], index: 8, kind: input, shape index: {}]   ;;  %s4520_s9 = inlined_call_operand.vmem [shape: f32[2,1,128], index: 9, kind: input, shape index: {}]   ;;  %s4521_s10 = inlined_call_operand.vmem [shape: bf16[2,128,256], index: 10, kind: input, shape index: {}]   ;;  %s4522_s11 = inlined_call_operand.vmem [shape: f32[2,1,256], index: 11, kind: input, shape index: {}]   ;;  %s4523_s12 = inlined_call_operand.hbm [shape: bf16[2,256,128], index: 12, kind: input, shape index: {}]   ;;  %s4524_s13 = inlined_call_operand.vmem [shape: f32[2,1,128], index: 13, kind: input, shape index: {}]   ;;  %s4525_s14 = inlined_call_operand.vmem [shape: f32[2,1,128], index: 14, kind: input, shape index: {}]   ;;  %s4526_s15 = inlined_call_operand.vmem [shape: f32[2,1,128], index: 15, kind: input, shape index: {}]   ;;  %s4527_s16 = inlined_call_operand.vmem [shape: bf16[128,128], index: 16, kind: input, shape index: {}]   ;;  %s4528_s17 = inlined_call_operand.vmem [shape: f32[1,128], index: 17, kind: input, shape index: {}]   ;;  %s4529_s18 = inlined_call_operand.vmem [shape: f32[2,2,128], index: 18, kind: output, shape index: {}]  }
   0x1   :  { %4531 = sst [smem:[#allocation10_spill]] %s4511_s0 }
   0x2   :  { %4532 = sst [smem:[#allocation11_spill]] %s4512_s1 }
   0x3   :  { %4533 = sst [smem:[#allocation12_spill]] %s4513_s2 }
   0x4   :  { %4534 = sst [smem:[#allocation13_spill]] %s4515_s4 }
   0x5   :  { %4535 = sst [smem:[#allocation14_spill]] %s4517_s6 }
   0x6   :  { %23 = vsyncpa [#allocation3], 0 }
   0x7   :  { %24 = vsyncpa [#allocation5], 0  ;;  %s3980_s27 = smov 0  }
   0x8 LB: > { %4536 = sst [smem:[#allocation9_spill]] %s3874_s27  ;;  %s3989_s0 = sadd.s32 4294967295, %s3874_s27   ;;  %s3874_s27 = sphi %s3980_s27, %s30_s27  }
   0x9   : > { %s4537_s6 = sld [smem:[#allocation14_spill]]  ;;  %p2893_p0 = scmp.ge.s32.totalorder %s3874_s27, 1 }
   0xa   : > { %p449_p1 = scmp.lt.s32.totalorder %s3874_s27, 3  ;;  %p3650_p2 = scmp.eq.s32.totalorder %s3989_s0, 0 }
   0xb   : > { %s3876_s1 = smov [#allocation4]   ;;  %s4539_s4 = sld [smem:[#allocation13_spill]] }
   0xc   : > { %p3994_p3 = pnand %p2893_p0, %p449_p1  ;;  %s485_s20 = sshll.u32 %s3876_s1, 4  ;;  %s486_s20 = int_to_ptr.vmem [resolvable:$true] %s485_s20 }
   0xd   : > { %s3877_s24 = smov [#allocation2]   ;;  %s3878_s26 = smov 64  }
   0xe   : > { %p3640_p4 = pneg %p3994_p3  ;;  %s468_s25 = sshll.u32 %s3877_s24, 4  ;;  %s469_s25 = int_to_ptr.vmem [resolvable:$true] %s468_s25 }
   0xf   : > { %s483_s30 = sshll.u32 %s4537_s6, 4  ;;  %s3879_s28 = smov 4   ;;  %s484_s30 = int_to_ptr.hbm [resolvable:$true] %s483_s30 }
  0x10   : > { %p4005_p5 = pnand %p3650_p2, %p3640_p4  ;;  %s512_s21 = sshll.u32 %s4523_s12, 4  ;;  %s513_s21 = int_to_ptr.hbm [resolvable:$true] %s512_s21 }
  0x11   : > { %s466_s2 = sshll.u32 %s4539_s4, 4  ;;  %s3880_s22 = smov 192   ;;  %s467_s2 = int_to_ptr.hbm [resolvable:$true] %s466_s2 }
  0x12   : > { %3646 = dma.hbm_to_vmem [thread:$0]  (!%p4005_p5), %s484_s30, 2048, %s486_s20, [#allocation5], %s3878_s26, %s3878_s26, %s3879_s28  }
  0x13   : > { %s3881_s4 = smov 12   ;;  %s3882_s6 = smov [#allocation6]  }
  0x14   : > { %3643 = dma.hbm_to_vmem [thread:$0]  (!%p4005_p5), %s467_s2, 6144, %s469_s25, [#allocation3], %s3880_s22, %s3880_s22, %s3881_s4  }
  0x15   : > { %s514_s27 = sshll.u32 %s3882_s6, 4  ;;  %562 = sbr.rel (%p3994_p3) target bundleno = 4508 (0x119c), region = 92  ;;  %s515_s27 = int_to_ptr.vmem [resolvable:$true] %s514_s27 }
  0x16   : > { %3649 = dma.hbm_to_vmem [thread:$0]  (!%p4005_p5), %s513_s21, 4096, %s515_s27, [#allocation5], %s3878_s26, %s3878_s26, %s3879_s28  }
  0x1a   : > { %3865 = dma.done.wait (%p3650_p2), [#allocation3], 6144  }
  0x1b   : > { %3867 = vsyncadd (%p3650_p2), [#allocation3], 4294961152 }
  0x1c   : > { %3869 = dma.done.wait (%p3650_p2), [#allocation5], 6144  }
  0x1d   : > { %3871 = vsyncadd (%p3650_p2), [#allocation5], 4294961152  ;;  %s2902_s4 = sshll.u32 %s3989_s0, 1  ;;  %s4541_s19 = sld [smem:[#allocation10_spill]]  ;;  %v3883_v2 = vmov 128.0   ;;  %vm930_vm7 = vcmask 523264  }
  0x1e   : > { %p631_p6 = scmp.lt.s32.totalorder %s2902_s4, 3  ;;  %3698 = vrcp.f32 %v3883_v2  ;;  %v2992_v17 = vld [vmem:[#allocation2 + $0xa8] sm:$0xf]  ;;  %v3514_v18 = vld [vmem:[#allocation2 + $0xb0] sm:$0xf0]  ;;  %s4542_s24 = sld [smem:[#allocation12_spill]] }
  0x1f   : > { %v3513_v19 = vld [vmem:[#allocation2 + $0xac] sm:$0xf]  ;;  %v2993_v20 = vor.u32 %v3514_v18, %v2992_v17  ;;  %v2994_v21 = vld [vmem:[#allocation2 + $0xb4] sm:$0xf0]  ;;  %v3000_v22 = vld [vmem:[#allocation2 + $0xb0] sm:$0xf] }
  0x20   : > { %s4546_s4 = smov (!%p631_p6, %s2902_s4), 3  ;;  %v3515_v23 = vld [vmem:[#allocation2 + $0xb8] sm:$0xf0]  ;;  %v2997_v24 = vor.u32 %v3513_v19, %v2994_v21  ;;  %v2980_v26 = vld [vmem:[#allocation2 + $0x90] sm:$0xf]  ;;  %s3884_s1 = smov 64  }
  0x21   : > { %s2903_s6 = sshll.u32 %s4546_s4, 3  ;;  %v3001_v25 = vor.u32 %v3515_v23, %v3000_v22  ;;  %882 = vmatpush.bf16.msra.mxu0 %v2993_v20  ;;  %v3511_v27 = vld [vmem:[#allocation2 + $0x98] sm:$0xf0]  ;;  %v3510_v28 = vld [vmem:[#allocation2 + $0x94] sm:$0xf]  ;;  %vm1007_vm8 = vcmask 1043456  }
  0x22   : > { %896 = vmatpush.bf16.msra.mxu1 %v2997_v24  ;;  %v2981_v29 = vor.u32 %v3511_v27, %v2980_v26  ;;  %v2982_v30 = vld [vmem:[#allocation2 + $0x9c] sm:$0xf0]  ;;  %v2988_v31 = vld [vmem:[#allocation2 + $0x98] sm:$0xf]  ;;  %v3512_v32 = vld [vmem:[#allocation2 + $0xa0] sm:$0xf0] }
  0x23   : > { %s634_s20 = scalar_lea.vmem %s4541_s19, %s2903_s6  ;;  %910 = vmatpush.bf16.msra.mxu2 %v3001_v25  ;;  %v2985_v33 = vor.u32 %v3510_v28, %v2982_v30  ;;  %v2989_v34 = vor.u32 %v3512_v32, %v2988_v31  ;;  %v2968_v35 = vld [vmem:[#allocation2 + $0x78] sm:$0xf]  ;;  %v3508_v36 = vld [vmem:[#allocation2 + $0x80] sm:$0xf0]  ;;  %v3507_v37 = vld [vmem:[#allocation2 + $0x7c] sm:$0xf] }
  0x24   : > { %v646_v0 = vld [vmem:[%s634_s20] sm:$0xff]  ;;  %v647_v1 = vld [vmem:[%s634_s20 + $0x8] sm:$0xff]  ;;  %v3699_v3 = vpop.eup %3698  ;;  %v2969_v38 = vor.u32 %v3508_v36, %v2968_v35  ;;  %v2958_v48 = vld [vmem:[#allocation2 + $0x6c] sm:$0xf0]  ;;  %s4543_s6 = sld [smem:[#allocation11_spill]]  ;;  %vm979_vm9 = vcmask 64512  }
  0x25   : > { %650 = vadd.xlane.f32.xlu0 %v646_v0  ;;  %v655_v4 = vmul.f32 128.0, %v3699_v3  ;;  %vm659_vm0 = vweird.f32 %v3699_v3  ;;  %883 = vmatpush.bf16.msra.mxu0 %v2981_v29  ;;  %v2970_v39 = vld [vmem:[#allocation2 + $0x84] sm:$0xf0]  ;;  %v2976_v40 = vld [vmem:[#allocation2 + $0x80] sm:$0xf]  ;;  %p641_p7 = scmp.lt.s32.totalorder %s3989_s0, 1 }
  0x26   : > { %897 = vmatpush.bf16.msra.mxu1 %v2985_v33  ;;  %v3509_v41 = vld [vmem:[#allocation2 + $0x88] sm:$0xf0]  ;;  %v2973_v42 = vor.u32 %v3507_v37, %v2970_v39  ;;  %v2956_v44 = vld [vmem:[#allocation2 + $0x60] sm:$0xf]  ;;  %v3504_v46 = vld [vmem:[#allocation2 + $0x64] sm:$0xf] }
  0x27   : > { %v656_v5 = vsub.f32 1.0, %v655_v4  ;;  %911 = vmatpush.bf16.msra.mxu2 %v2989_v34  ;;  %v2977_v43 = vor.u32 %v3509_v41, %v2976_v40  ;;  %v3505_v45 = vld [vmem:[#allocation2 + $0x68] sm:$0xf0]  ;;  %v2964_v49 = vld [vmem:[#allocation2 + $0x68] sm:$0xf]  ;;  %v2961_v51 = vor.u32 %v3504_v46, %v2958_v48  ;;  %s4548_s0 = smov (!%p641_p7, %s3989_s0), 1 }
  0x28   : > { %v2957_v47 = vor.u32 %v3505_v45, %v2956_v44  ;;  %v3506_v50 = vld [vmem:[#allocation2 + $0x70] sm:$0xf0]  ;;  %v2944_v53 = vld [vmem:[#allocation2 + $0x48] sm:$0xf]  ;;  %v3501_v55 = vld [vmem:[#allocation2 + $0x4c] sm:$0xf] }
  0x29   : > { %v657_v6 = vmul.f32 %v3699_v3, %v656_v5  ;;  %884 = vmatpush.bf16.msra.mxu0 %v2969_v38  ;;  %v2965_v52 = vor.u32 %v3506_v50, %v2964_v49  ;;  %v3502_v54 = vld [vmem:[#allocation2 + $0x50] sm:$0xf0]  ;;  %v2946_v57 = vld [vmem:[#allocation2 + $0x54] sm:$0xf0]  ;;  %v2952_v58 = vld [vmem:[#allocation2 + $0x50] sm:$0xf] }
  0x2a   : > { %898 = vmatpush.bf16.msra.mxu1 %v2973_v42  ;;  %v2945_v56 = vor.u32 %v3502_v54, %v2944_v53  ;;  %v3503_v59 = vld [vmem:[#allocation2 + $0x58] sm:$0xf0]  ;;  %v2949_v60 = vor.u32 %v3501_v55, %v2946_v57  ;;  %v2932_v62 = vld [vmem:[#allocation2 + $0x30] sm:$0xf]  ;;  %v2934_v2 = vld [vmem:[#allocation2 + $0x3c] sm:$0xf0]  ;;  %s639_s27 = scalar_lea.vmem %s4543_s6, %s4546_s4 }
  0x2b   : > { %v658_v7 = vadd.f32 %v3699_v3, %v657_v6  ;;  %912 = vmatpush.bf16.msra.mxu2 %v2977_v43  ;;  %v2953_v61 = vor.u32 %v3503_v59, %v2952_v58  ;;  %v3499_v63 = vld [vmem:[#allocation2 + $0x38] sm:$0xf0]  ;;  %v3500_v4 = vld [vmem:[#allocation2 + $0x40] sm:$0xf0]  ;;  %v2908_v19 = vld [vmem:[#allocation2] sm:$0xf] }
  0x2c   : > { %v3493_v20 = vld [vmem:[#allocation2 + $0x8] sm:$0xf0]  ;;  %v3492_v21 = vld [vmem:[#allocation2 + $0x4] sm:$0xf]  ;;  %v2910_v24 = vld [vmem:[#allocation2 + $0xc] sm:$0xf0] }
  0x2d   : > { %652 = vadd.xlane.f32.xlu0 %v647_v1  ;;  %v4035_v8 = vsel %vm659_vm0, %v3699_v3, %v658_v7  ;;  %885 = vmatpush.bf16.msra.mxu0 %v2957_v47  ;;  %v2940_v3 = vld [vmem:[#allocation2 + $0x38] sm:$0xf]  ;;  %v2909_v23 = vor.u32 %v3493_v20, %v2908_v19  ;;  %v2916_v25 = vld [vmem:[#allocation2 + $0x8] sm:$0xf]  ;;  %v3494_v26 = vld [vmem:[#allocation2 + $0x10] sm:$0xf0]  ;;  %v2913_v28 = vor.u32 %v3492_v21, %v2910_v24 }
  0x2e   : > { %899 = vmatpush.bf16.msra.mxu1 %v2961_v51  ;;  %v2941_v6 = vor.u32 %v3500_v4, %v2940_v3  ;;  %v2920_v7 = vld [vmem:[#allocation2 + $0x18] sm:$0xf]  ;;  %v2917_v29 = vor.u32 %v3494_v26, %v2916_v25  ;;  %v3683_v47 = vld [vmem:[%s4542_s24] ss:$0 sm:$0xff]  ;;  %s2905_s23 = sshll.u32 %s4548_s0, 1 }
  0x2f   : > { %913 = vmatpush.bf16.msra.mxu2 %v2965_v52  ;;  %v3684_v52 = vld [vmem:[%s4514_s3] ss:$0 sm:$0xff]  ;;  %s644_s25 = scalar_lea.vmem %s4529_s18, %s2905_s23 }
  0x31   : > { %886 = vmatpush.bf16.msra.mxu0 %v2945_v56 }
  0x32   : > { %900 = vmatpush.bf16.msra.mxu1 %v2949_v60 }
  0x33   : > { %914 = vmatpush.bf16.msra.mxu2 %v2953_v61 }
  0x37   : > { %915 = vmatpush.bf16.msra.mxu2 %v2941_v6 }
  0x98   : > { %v651_v9 = vpop.xlane.xlu0 %650 }
  0x99   : > { %v661_v10 = vmul.f32 %v4035_v8, %v651_v9  ;;  %v3496_v9 = vld [vmem:[#allocation2 + $0x20] sm:$0xf0] }
  0x9b   : > { %v4038_v11 = vsub.f32 %v646_v0, %v661_v10  ;;  %v3498_v0 = vld [vmem:[#allocation2 + $0x34] sm:$0xf]  ;;  %v3495_v10 = vld [vmem:[#allocation2 + $0x1c] sm:$0xf] }
  0x9c   : > { %v2937_v5 = vor.u32 %v3498_v0, %v2934_v2 }
  0x9d   : > { %v665_v12 = vmul.f32 %v4038_v11, %v4038_v11 }
  0x9e   : > { %901 = vmatpush.bf16.msra.mxu1 %v2937_v5 }
  0x9f   : > { %667 = vadd.xlane.f32.xlu1 %v665_v12  ;;  %v2921_v12 = vor.u32 %v3496_v9, %v2920_v7 }
  0xa0   : > { %v653_v13 = vpop.xlane.xlu0 %652 }
  0xa1   : > { %v662_v14 = vmul.f32 %v4035_v8, %v653_v13  ;;  %v2922_v13 = vld [vmem:[#allocation2 + $0x24] sm:$0xf0] }
  0xa2   : > { %v2925_v17 = vor.u32 %v3495_v10, %v2922_v13 }
  0xa3   : > { %v4043_v15 = vsub.f32 %v647_v1, %v662_v14  ;;  %v2933_v1 = vor.u32 %v3499_v63, %v2932_v62  ;;  %v2928_v14 = vld [vmem:[#allocation2 + $0x20] sm:$0xf] }
  0xa4   : > { %902 = vmatpush.bf16.msra.mxu1 %v2925_v17 }
  0xa5   : > { %v666_v16 = vmul.f32 %v4043_v15, %v4043_v15  ;;  %887 = vmatpush.bf16.msra.mxu0 %v2933_v1 }
  0xa7   : > { %669 = vadd.xlane.f32.xlu1 %v666_v16  ;;  %v3497_v16 = vld [vmem:[#allocation2 + $0x28] sm:$0xf0] }
  0xa8   : > { %v2929_v18 = vor.u32 %v3497_v16, %v2928_v14  ;;  %903 = vmatpush.bf16.msra.mxu1 %v2913_v28 }
  0xa9   : > { %888 = vmatpush.bf16.msra.mxu0 %v2921_v12 }
  0xaa   : > { %916 = vmatpush.bf16.msra.mxu2 %v2929_v18 }
  0xad   : > { %889 = vmatpush.bf16.msra.mxu0 %v2909_v23 }
  0xae   : > { %917 = vmatpush.bf16.msra.mxu2 %v2917_v29  ;;  %v707_v29 = vld [vmem:[%s639_s27] sm:$0x1] }
 0x112   : > { %v668_v22 = vpop.xlane.xlu1 %667 }
 0x113   : > { %v671_v27 = vmul.f32 %v668_v22, %v4035_v8 }
 0x115   : > { %v673_v30 = vadd.f32 1e-12, %v671_v27 }
 0x117   : > { %3700 = vrsqrt.f32 %v673_v30  ;;  %vm681_vm2 = vweird.f32 %v673_v30 }
 0x11a   : > { %v670_v31 = vpop.xlane.xlu1 %669 }
 0x11b   : > { %v672_v32 = vmul.f32 %v670_v31, %v4035_v8  ;;  %v709_v31 = vsub.f32 1.0, %v707_v29 }
 0x11d   : > { %v3701_v33 = vpop.eup %3700  ;;  %v674_v34 = vadd.f32 1e-12, %v672_v32  ;;  %v711_v32 = vmul.f32 -10000.0, %v709_v31 }
 0x11e   : > { %v676_v35 = vmul.f32 %v3701_v33, %v673_v30  ;;  %vm682_vm1 = vweird.f32 %v3701_v33 }
 0x11f   : > { %3702 = vrsqrt.f32 %v674_v34  ;;  %vm683_vm3 = vmor %vm681_vm2, %vm682_vm1  ;;  %vm691_vm5 = vweird.f32 %v674_v34 }
 0x120   : > { %v677_v36 = vmul.f32 %v3701_v33, %v676_v35 }
 0x122   : > { %v678_v37 = vmul.f32 0.5, %v677_v36 }
 0x124   : > { %v679_v38 = vsub.f32 1.5, %v678_v37 }
 0x125   : > { %v3703_v39 = vpop.eup %3702 }
 0x126   : > { %v680_v40 = vmul.f32 %v3701_v33, %v679_v38  ;;  %v686_v41 = vmul.f32 %v3703_v39, %v674_v34  ;;  %vm692_vm4 = vweird.f32 %v3703_v39  ;;  %v4088_v34 = vperm.slane %v711_v32, 0 }
 0x127   : > { %vm693_vm6 = vmor %vm691_vm5, %vm692_vm4 }
 0x128   : > { %v687_v42 = vmul.f32 %v3703_v39, %v686_v41  ;;  %v684_v43 = vsel %vm683_vm3, %v3701_v33, %v680_v40 }
 0x129   : > { %v695_v46 = vmul.f32 %v684_v43, %v4038_v11 }
 0x12a   : > { %v688_v44 = vmul.f32 0.5, %v687_v42  ;;  %v708_v42 = vld [vmem:[%s639_s27 + $0x1] sm:$0x1] }
 0x12b   : > { %v700_v51 = vmul.f32 %v3683_v47, %v695_v46  ;;  %v710_v43 = vsub.f32 1.0, %v708_v42 }
 0x12c   : > { %v689_v45 = vsub.f32 1.5, %v688_v44 }
 0x12d   : > { %v4057_v54 = vadd.f32 %v3684_v52, %v700_v51  ;;  %v712_v46 = vmul.f32 -10000.0, %v710_v43 }
 0x12e   : > { %v690_v48 = vmul.f32 %v3703_v39, %v689_v45 }
 0x130   : > { %v694_v49 = vsel %vm693_vm6, %v3703_v39, %v690_v48 }
 0x131   : > { %v696_v50 = vmul.f32 %v694_v49, %v4043_v15  ;;  %v746_v15 = vld [vmem:[%s4516_s5] sm:$0x7]  ;;  %v4092_v49 = vperm.slane %v712_v46, 0 }
 0x132   : > { %v749_v56 = vperm.slane %v746_v15, 1  ;;  %v748_v60 = vperm.slane %v746_v15, 0  ;;  %v750_v62 = vperm.slane %v746_v15, 2 }
 0x133   : > { %v701_v53 = vmul.f32 %v3683_v47, %v696_v50 }
 0x135   : > { %v4059_v55 = vadd.f32 %v3684_v52, %v701_v53 }
 0x137   : > { %v713_v11 = vpack.c.bf16 %v4059_v55, %v4057_v54 }
 0x139   : > { %890 = vmatmul.bf16.vlgmr.msra.gmra.mxu0 %v713_v11  ;;  %904 = vmatmul.bf16.vlgmr.msra.gmra.mxu1 %v713_v11 }
 0x13a   : > { %918 = vmatmul.bf16.vlgmr.msra.gmra.mxu2 %v713_v11 }
 0x1b6   : > { %v891_v57 = vpop.f32.mrf.mxu0  ;;  %v905_v58 = vpop.f32.mrf.mxu1 }
 0x1b7   : > { %v906_v59 = vadd.f32 %v905_v58, %v749_v56  ;;  %v892_v1 = vadd.f32 %v891_v57, %v748_v60 }
 0x1b9   : > { %v926_v61 = vpack.c.bf16 %v906_v59, %v906_v59  ;;  %v924_v12 = vpack.c.bf16 %v892_v1, %v892_v1 }
 0x1bb   : > { %v1049_v63 = vunpack.c.l.b16 %v926_v61  ;;  %v935_v0 = vsel %vm930_vm7, %v926_v61, 0 }
 0x1bc   : > { %944 = vmatpush.bf16.xpose.msra.mxu3 %v935_v0 }
 0x1bd   : > { %v1050_v2 = vpack.c.b16 %v1049_v63, %v1049_v63  ;;  %v919_v3 = vpop.f32.mrf.mxu2 }
 0x1be   : > { %v920_v4 = vadd.f32 %v919_v3, %v750_v62  ;;  %v893_v5 = vpop.f32.mrf.mxu0  ;;  %v907_v6 = vpop.f32.mrf.mxu1 }
 0x1bf   : > { %v894_v7 = vadd.f32 %v893_v5, %v748_v60  ;;  %v908_v9 = vadd.f32 %v907_v6, %v749_v56  ;;  %1051 = vrot.lane.b32.xlu0 %v1050_v2, %s3884_s1  ;;  %v1044_v56 = vunpack.c.l.b16 %v924_v12 }
 0x1c0   : > { %v4068_v10 = vpack.c.bf16 %v920_v4, %v920_v4 }
 0x1c1   : > { %v925_v13 = vpack.c.bf16 %v894_v7, %v894_v7  ;;  %v927_v14 = vpack.c.bf16 %v908_v9, %v908_v9  ;;  %v1045_v57 = vpack.c.b16 %v1044_v56, %v1044_v56  ;;  %v3519_v56 = vld [vmem:[#allocation4 + $0x18] sm:$0xff] }
 0x1c2   : > { %v1009_v19 = vsel %vm1007_vm8, %v4068_v10, 0 }
 0x1c3   : > { %v1073_v16 = vunpack.c.l.b16 %v925_v13  ;;  %v1078_v17 = vunpack.c.l.b16 %v927_v14  ;;  %3002 = vmatmul.msk.bf16.vlgmr.msra.gmra.mxu3 %vm930_vm7, %v924_v12  ;;  %v954_v18 = vsel %vm930_vm7, %v927_v14, 0 }
 0x1c4   : > { %963 = vmatpush.bf16.xpose.msrb.mxu3 %v954_v18 }
 0x1c5   : > { %v1074_v20 = vpack.c.b16 %v1073_v16, %v1073_v16  ;;  %v1079_v21 = vpack.c.b16 %v1078_v17, %v1078_v17  ;;  %v921_v22 = vpop.f32.mrf.mxu2  ;;  %v1130_v16 = vunpack.c.l.b16 %v4068_v10 }
 0x1c6   : > { %v922_v23 = vadd.f32 %v921_v22, %v750_v62 }
 0x1c7   : > { %1080 = vrot.lane.b32.xlu1 %v1079_v21, %s3884_s1  ;;  %1075 = vrot.lane.b32.xlu0 %v1074_v20, %s3884_s1  ;;  %v1131_v17 = vpack.c.b16 %v1130_v16, %v1130_v16 }
 0x1c8   : > { %v4076_v24 = vpack.c.bf16 %v922_v23, %v922_v23 }
 0x1ca   : > { %v1028_v25 = vsel %vm1007_vm8, %v4076_v24, 0 }
 0x1cb   : > { %1037 = vmatpush.bf16.msrb.mxu0 %v1028_v25 }
 0x1cc   : > { %1018 = vmatpush.bf16.msra.mxu3 %v1009_v19 }
 0x1d3   : > { %3003 = vmatmul.msk.bf16.vlgmr.msrb.gmra.mxu3 %vm930_vm7, %v925_v13 }
 0x231   : > { %v1052_v26 = vpop.permute.xlu0 %1051 }
 0x232   : > { %v1057_v27 = vsel %vm930_vm7, %v1052_v26, 0 }
 0x233   : > { %1066 = vmatpush.bf16.xpose.msrb.mxu3 %v1057_v27 }
 0x239   : > { %v1081_v28 = vpop.permute.xlu1 %1080  ;;  %v1076_v33 = vpop.permute.xlu0 %1075 }
 0x23a   : > { %v1086_v30 = vsel %vm930_vm7, %v1081_v28, 0 }
 0x23b   : > { %1095 = vmatpush.bf16.xpose.msrb.mxu2 %v1086_v30 }
 0x242   : > { %3007 = vmatmul.msk.bf16.vlgmr.msrb.gmra.mxu2 %vm930_vm7, %v1076_v33 }
 0x246   : > { %v946_v35 = vpop.f32.mrf.mxu3 }
 0x247   : > { %v969_v36 = vmul.f32 0.125, %v946_v35 }
 0x249   : > { %v977_v37 = vadd.f32 %v4088_v34, %v969_v36 }
 0x24b   : > { %v980_v38 = vsel %vm979_vm9, %v977_v37, -inf }
 0x24c   : > { %981 = vmax.xlane.f32.xlu2 %v980_v38 }
 0x24e   : > { %v948_v39 = vpop.f32.mrf.mxu3 }
 0x256   : > { %v965_v40 = vpop.f32.mrf.mxu3 }
 0x257   : > { %v970_v58 = vmul.f32 0.125, %v965_v40 }
 0x259   : > { %v978_v59 = vadd.f32 %v4092_v49, %v970_v58 }
 0x25b   : > { %v983_v60 = vsel %vm979_vm9, %v978_v59, -inf }
 0x25e   : > { %v967_v41 = vpop.f32.mrf.mxu3 }
 0x2bf   : > { %v982_v44 = vpop.xlane.xlu2 %981 }
 0x2c0   : > { %v986_v45 = vsub.f32 %v977_v37, %v982_v44  ;;  %v1154_v37 = vunpack.c.l.b16 %v4076_v24 }
 0x2c2   : > { %v988_v47 = vmul.f32 1.442695, %v986_v45  ;;  %v1155_v38 = vpack.c.b16 %v1154_v37, %v1154_v37  ;;  %v3535_v37 = vld [vmem:[%s4521_s10 + $0x54] sm:$0xf0] }
 0x2c4   : > { %3704 = vpow2.f32 %v988_v47 }
 0x2c5   : > { %v1097_v48 = vpop.f32.mrf.mxu2 }
 0x2c6   : > { %v1102_v50 = vmul.f32 0.125, %v1097_v48 }
 0x2c8   : > { %v1104_v51 = vadd.f32 %v1102_v50, %v4092_v49 }
 0x2ca   : > { %v3705_v52 = vpop.eup %3704  ;;  %v1108_v53 = vsel %vm979_vm9, %v1104_v51, -inf }
 0x2cb   : > { %1109 = vmax.xlane.f32.xlu0 %v1108_v53  ;;  %v992_v11 = vsel %vm979_vm9, %v3705_v52, 0.0  ;;  %v3521_v53 = vld [vmem:[#allocation4 + $0x28] sm:$0xff] }
 0x2cc   : > { %993 = vadd.xlane.f32.xlu2 %v992_v11  ;;  %v3520_v11 = vld [vmem:[#allocation4 + $0x20] sm:$0xff] }
 0x2cd   : > { %v1099_v15 = vpop.f32.mrf.mxu2 }
 0x2e4   : > { %1046 = vrot.lane.b32.xlu2 %v1045_v57, %s3884_s1  ;;  %v3518_v57 = vld [vmem:[#allocation4 + $0x10] sm:$0xff] }
 0x30d   : > { %984 = vmax.xlane.f32.xlu2 %v983_v60 }
 0x33e   : > { %v1110_v61 = vpop.xlane.xlu0 %1109 }
 0x33f   : > { %v1112_v62 = vsub.f32 %v1104_v51, %v1110_v61  ;;  %v994_v63 = vpop.xlane.xlu2 %993  ;;  %v3523_v51 = vld [vmem:[#allocation4 + $0x38] sm:$0xff] }
 0x340   : > { %3706 = vrcp.f32 %v994_v63  ;;  %1256 = vmatpush.bf16.msrb.mxu1 %v3523_v51  ;;  %v3516_v63 = vld [vmem:[#allocation4] sm:$0xff] }
 0x341   : > { %v1115_v0 = vmul.f32 1.442695, %v1112_v62 }
 0x343   : > { %3708 = vpow2.f32 %v1115_v0 }
 0x346   : > { %v3707_v1 = vpop.eup %3706 }
 0x347   : > { %v1000_v2 = vmul.f32 %v3707_v1, %v3705_v52  ;;  %v1047_v6 = vpop.permute.xlu2 %1046  ;;  %v3522_v52 = vld [vmem:[#allocation4 + $0x30] sm:$0xff] }
 0x348   : > { %1257 = vmatpush.bf16.msrb.mxu1 %v3522_v52  ;;  %v3070_v52 = vld [vmem:[%s4521_s10 + $0x38] sm:$0xf0] }
 0x349   : > { %v3709_v3 = vpop.eup %3708  ;;  %v1002_v4 = vpack.c.bf16 %v1000_v2, %v1000_v2 }
 0x34a   : > { %v1120_v5 = vsel %vm979_vm9, %v3709_v3, 0.0 }
 0x34b   : > { %1121 = vadd.xlane.f32.xlu0 %v1120_v5  ;;  %3004 = vmatmul.msk.bf16.vlgmr.msra.gmra.mxu3 %vm979_vm9, %v1002_v4 }
 0x34c   : > { %1258 = vmatpush.bf16.msrb.mxu1 %v3521_v53 }
 0x350   : > { %1259 = vmatpush.bf16.msrb.mxu1 %v3520_v11  ;;  %v3060_v11 = vld [vmem:[%s4521_s10 + $0x20] sm:$0xf] }
 0x354   : > { %1260 = vmatpush.bf16.msrb.mxu1 %v3519_v56  ;;  %v3528_v56 = vld [vmem:[%s4521_s10 + $0x24] sm:$0xf] }
 0x358   : > { %1261 = vmatpush.bf16.msrb.mxu1 %v3518_v57 }
 0x35b   : > { %3006 = vmatmul.msk.bf16.vlgmr.msrb.gmra.mxu3 %vm930_vm7, %v1047_v6  ;;  %v3685_v6 = vld [vmem:[%s4518_s7] ss:$0 sm:$0xff] }
 0x380   : > { %v985_v7 = vpop.xlane.xlu2 %984 }
 0x381   : > { %v987_v9 = vsub.f32 %v978_v59, %v985_v7  ;;  %v3517_v59 = vld [vmem:[#allocation4 + $0x8] sm:$0xff] }
 0x382   : > { %1262 = vmatpush.bf16.msrb.mxu1 %v3517_v59 }
 0x383   : > { %v990_v12 = vmul.f32 1.442695, %v987_v9 }
 0x385   : > { %3710 = vpow2.f32 %v990_v12 }
 0x386   : > { %1263 = vmatpush.bf16.msrb.mxu1 %v3516_v63 }
 0x38b   : > { %v3711_v13 = vpop.eup %3710 }
 0x38c   : > { %v995_v14 = vsel %vm979_vm9, %v3711_v13, 0.0 }
 0x38d   : > { %996 = vadd.xlane.f32.xlu2 %v995_v14 }
 0x3a5   : > { %1132 = vrot.lane.b32.xlu2 %v1131_v17, %s3884_s1 }
 0x3be   : > { %v1122_v45 = vpop.xlane.xlu0 %1121 }
 0x3ce   : > { %v4106_v18 = vpop.f32.mrf.mxu3 }
 0x3d6   : > { %v1022_v19 = vpop.f32.mrf.mxu3 }
 0x3de   : > { %v1068_v20 = vpop.f32.mrf.mxu3 }
 0x3df   : > { %v1101_v21 = vmul.f32 0.125, %v1068_v20 }
 0x3e1   : > { %v1103_v22 = vadd.f32 %v1101_v21, %v4088_v34 }
 0x3e3   : > { %v1105_v23 = vsel %vm979_vm9, %v1103_v22, -inf }
 0x3e4   : > { %1106 = vmax.xlane.f32.xlu1 %v1105_v23 }
 0x3e6   : > { %v1070_v25 = vpop.f32.mrf.mxu3 }
 0x3e7   : > { %v3539_v25 = vld [vmem:[%s4521_s10 + $0x74] sm:$0xf0] }
 0x400   : > { %v997_v26 = vpop.xlane.xlu2 %996 }
 0x401   : > { %3712 = vrcp.f32 %v997_v26  ;;  %v3538_v26 = vld [vmem:[%s4521_s10 + $0x74] sm:$0xf] }
 0x407   : > { %v3713_v27 = vpop.eup %3712 }
 0x408   : > { %v1001_v28 = vmul.f32 %v3713_v27, %v3711_v13  ;;  %v1133_v29 = vpop.permute.xlu2 %1132 }
 0x409   : > { %v1138_v10 = vsel %vm1007_vm8, %v1133_v29, 0 }
 0x40a   : > { %1147 = vmatpush.bf16.msra.mxu3 %v1138_v10  ;;  %v1003_v30 = vpack.c.bf16 %v1001_v28, %v1001_v28  ;;  %v3102_v28 = vld [vmem:[%s4521_s10 + $0x78] sm:$0xf0]  ;;  %v3092_v10 = vld [vmem:[%s4521_s10 + $0x60] sm:$0xf] }
 0x40b   : > { %v3105_v29 = vor.u32 %v3538_v26, %v3102_v28 }
 0x40c   : > { %3005 = vmatmul.msk.bf16.vlgmr.msrb.gmra.mxu0 %vm979_vm9, %v1003_v30  ;;  %v3537_v30 = vld [vmem:[%s4521_s10 + $0x64] sm:$0xf0] }
 0x40e   : > { %1441 = vmatpush.bf16.msrb.mxu3 %v3105_v29 }
 0x457   : > { %v1107_v31 = vpop.xlane.xlu1 %1106 }
 0x458   : > { %v1111_v32 = vsub.f32 %v1103_v22, %v1107_v31  ;;  %v3536_v31 = vld [vmem:[%s4521_s10 + $0x64] sm:$0xf] }
 0x45a   : > { %v1113_v33 = vmul.f32 1.442695, %v1111_v32  ;;  %v3093_v32 = vor.u32 %v3537_v30, %v3092_v10 }
 0x45c   : > { %3714 = vpow2.f32 %v1113_v33  ;;  %v3094_v33 = vld [vmem:[%s4521_s10 + $0x68] sm:$0xf0] }
 0x462   : > { %v3715_v35 = vpop.eup %3714 }
 0x463   : > { %v1117_v36 = vsel %vm979_vm9, %v3715_v35, 0.0 }
 0x464   : > { %1118 = vadd.xlane.f32.xlu1 %v1117_v36  ;;  %v3084_v36 = vld [vmem:[%s4521_s10 + $0x50] sm:$0xf] }
 0x47d   : > { %1156 = vrot.lane.b32.xlu1 %v1155_v38, %s3884_s1  ;;  %v3534_v38 = vld [vmem:[%s4521_s10 + $0x54] sm:$0xf] }
 0x489   : > { %v1039_v39 = vpop.f32.mrf.mxu0 }
 0x491   : > { %v1041_v40 = vpop.f32.mrf.mxu0 }
 0x492   : > { %v3086_v40 = vld [vmem:[%s4521_s10 + $0x58] sm:$0xf0] }
 0x4d7   : > { %v1119_v41 = vpop.xlane.xlu1 %1118 }
 0x4d8   : > { %3716 = vrcp.f32 %v1119_v41  ;;  %v3089_v41 = vor.u32 %v3534_v38, %v3086_v40 }
 0x4d9   : > { %3718 = vrcp.f32 %v1122_v45 }
 0x4de   : > { %v3717_v42 = vpop.eup %3716 }
 0x4df   : > { %v1125_v43 = vmul.f32 %v3717_v42, %v3715_v35  ;;  %v3719_v46 = vpop.eup %3718  ;;  %v3097_v35 = vor.u32 %v3536_v31, %v3094_v33  ;;  %v3076_v42 = vld [vmem:[%s4521_s10 + $0x40] sm:$0xf] }
 0x4e0   : > { %v1126_v47 = vmul.f32 %v3719_v46, %v3709_v3  ;;  %v3078_v46 = vld [vmem:[%s4521_s10 + $0x48] sm:$0xf0]  ;;  %v3686_v31 = vld [vmem:[%s4519_s8] ss:$0 sm:$0xff] }
 0x4e1   : > { %v1127_v44 = vpack.c.bf16 %v1125_v43, %v1125_v43  ;;  %1442 = vmatpush.bf16.msrb.mxu3 %v3097_v35  ;;  %v3533_v43 = vld [vmem:[%s4521_s10 + $0x44] sm:$0xf0] }
 0x4e2   : > { %v1128_v24 = vpack.c.bf16 %v1126_v47, %v1126_v47  ;;  %v3077_v45 = vor.u32 %v3533_v43, %v3076_v42  ;;  %v3555_v42 = vld [vmem:[#allocation6 + $0x78] sm:$0xff]  ;;  %v3554_v43 = vld [vmem:[#allocation6 + $0x70] sm:$0xff] }
 0x4e3   : > { %3008 = vmatmul.msk.bf16.vlgmr.msra.gmra.mxu3 %vm979_vm9, %v1127_v44  ;;  %v3532_v44 = vld [vmem:[%s4521_s10 + $0x44] sm:$0xf]  ;;  %1639 = vmatpush.bf16.msra.mxu1 %v3555_v42 }
 0x4e4   : > { %v3081_v47 = vor.u32 %v3532_v44, %v3078_v46  ;;  %v3545_v44 = vld [vmem:[#allocation6 + $0x28] sm:$0xff]  ;;  %v3544_v46 = vld [vmem:[#allocation6 + $0x20] sm:$0xff] }
 0x4e5   : > { %1443 = vmatpush.bf16.msrb.mxu3 %v3089_v41  ;;  %v3547_v41 = vld [vmem:[#allocation6 + $0x38] sm:$0xff] }
 0x4e7   : > { %1640 = vmatpush.bf16.msra.mxu1 %v3554_v43 }
 0x4e9   : > { %1444 = vmatpush.bf16.msrb.mxu3 %v3081_v47  ;;  %v3552_v47 = vld [vmem:[#allocation6 + $0x60] sm:$0xff] }
 0x4ef   : > { %v1157_v48 = vpop.permute.xlu1 %1156 }
 0x4f0   : > { %v1162_v50 = vsel %vm1007_vm8, %v1157_v48, 0  ;;  %v3068_v48 = vld [vmem:[%s4521_s10 + $0x30] sm:$0xf] }
 0x4f1   : > { %1171 = vmatpush.bf16.msra.mxu0 %v1162_v50  ;;  %v3531_v50 = vld [vmem:[%s4521_s10 + $0x34] sm:$0xf0] }
 0x4f2   : > { %v3069_v51 = vor.u32 %v3531_v50, %v3068_v48  ;;  %v3543_v48 = vld [vmem:[#allocation6 + $0x18] sm:$0xff] }
 0x4f3   : > { %v3551_v50 = vld [vmem:[#allocation6 + $0x58] sm:$0xff] }
 0x4f4   : > { %3009 = vmatmul.msk.bf16.vlgmr.msra.gmra.mxu0 %vm979_vm9, %v1128_v24  ;;  %v3530_v24 = vld [vmem:[%s4521_s10 + $0x34] sm:$0xf] }
 0x4f5   : > { %v3073_v53 = vor.u32 %v3530_v24, %v3070_v52  ;;  %1625 = vmatpush.bf16.msrb.mxu0 %v3547_v41  ;;  %v3542_v24 = vld [vmem:[#allocation6 + $0x10] sm:$0xff]  ;;  %v3541_v52 = vld [vmem:[#allocation6 + $0x8] sm:$0xff] }
 0x4f7   : > { %1445 = vmatpush.bf16.msrb.mxu3 %v3073_v53  ;;  %v3549_v53 = vld [vmem:[#allocation6 + $0x48] sm:$0xff] }
 0x566   : > { %v1149_v15 = vpop.f32.mrf.mxu3 }
 0x56e   : > { %v1151_v58 = vpop.f32.mrf.mxu3 }
 0x56f   : > { %v3062_v58 = vld [vmem:[%s4521_s10 + $0x28] sm:$0xf0] }
 0x570   : > { %v3065_v59 = vor.u32 %v3528_v56, %v3062_v58  ;;  %v3548_v56 = vld [vmem:[#allocation6 + $0x40] sm:$0xff] }
 0x571   : > { %v1173_v60 = vpop.f32.mrf.mxu0 }
 0x572   : > { %v3673_v61 = vpack.i.bf16 %v1173_v60, %v1149_v15  ;;  %v3529_v15 = vld [vmem:[%s4521_s10 + $0x24] sm:$0xf0]  ;;  %1446 = vmatpush.bf16.msrb.mxu3 %v3065_v59  ;;  %v3052_v60 = vld [vmem:[%s4521_s10 + $0x10] sm:$0xf] }
 0x573   : > { %v3061_v57 = vor.u32 %v3529_v15, %v3060_v11  ;;  %v1341_v11 = vld [vmem:[%s4522_s11] sm:$0x3] }
 0x574   : > { %3674 = vrot.lane.b32.xlu0 %v3673_v61, %s3884_s1  ;;  %v3527_v61 = vld [vmem:[%s4521_s10 + $0x14] sm:$0xf0]  ;;  %v3540_v15 = vld [vmem:[#allocation6] sm:$0xff]  ;;  %v1344_v58 = vperm.slane %v1341_v11, 1 }
 0x575   : > { %v3053_v63 = vor.u32 %v3527_v61, %v3052_v60 }
 0x579   : > { %v1175_v62 = vpop.f32.mrf.mxu0 }
 0x57a   : > { %v3526_v62 = vld [vmem:[%s4521_s10 + $0x14] sm:$0xf] }
 0x5e6   : > { %v3675_v0 = vpop.permute.xlu0 %3674 }
 0x5e7   : > { %v3677_v1 = vunpack.i.h.bf16 %v3675_v0  ;;  %v3676_v2 = vunpack.i.l.bf16 %v3675_v0  ;;  %v3054_v0 = vld [vmem:[%s4521_s10 + $0x18] sm:$0xf0] }
 0x5e9   : > { %v1185_v3 = vsel %vm930_vm7, %v4106_v18, %v3676_v2  ;;  %v1186_v4 = vsel %vm930_vm7, %v1039_v39, %v3677_v1  ;;  %v3085_v39 = vor.u32 %v3535_v37, %v3084_v36  ;;  %v3044_v1 = vld [vmem:[%s4521_s10] sm:$0xf]  ;;  %v3525_v2 = vld [vmem:[%s4521_s10 + $0x4] sm:$0xf0] }
 0x5ea   : > { %v1187_v5 = vpack.c.bf16 %v1186_v4, %v1185_v3  ;;  %v3057_v4 = vor.u32 %v3526_v62, %v3054_v0  ;;  %v3687_v37 = vld [vmem:[%s4520_s9] ss:$0 sm:$0xff] }
 0x5ec   : > { %1264 = vmatmul.bf16.vlgmr.msrb.gmra.mxu1 %v1187_v5  ;;  %v3524_v5 = vld [vmem:[%s4521_s10 + $0x4] sm:$0xf]  ;;  %1447 = vmatpush.bf16.msrb.mxu3 %v3057_v4 }
 0x669   : > { %v1265_v7 = vpop.f32.mrf.mxu1 }
 0x66a   : > { %v1266_v9 = vadd.f32 %v3685_v6, %v1265_v7 }
 0x66c   : > { %v1270_v12 = vadd.f32 %v1266_v9, %v4057_v54  ;;  %v3045_v9 = vor.u32 %v3525_v2, %v3044_v1 }
 0x66e   : > { %1274 = vadd.xlane.f32.xlu2 %v1270_v12 }
 0x671   : > { %v1267_v13 = vpop.f32.mrf.mxu1 }
 0x672   : > { %v1268_v14 = vadd.f32 %v3685_v6, %v1267_v13  ;;  %v3046_v6 = vld [vmem:[%s4521_s10 + $0x8] sm:$0xf0] }
 0x674   : > { %v1271_v16 = vadd.f32 %v1268_v14, %v4059_v55  ;;  %v3100_v55 = vld [vmem:[%s4521_s10 + $0x70] sm:$0xf] }
 0x675   : > { %v3101_v27 = vor.u32 %v3539_v25, %v3100_v55 }
 0x676   : > { %1276 = vadd.xlane.f32.xlu0 %v1271_v16 }
 0x677   : > { %1427 = vmatpush.bf16.msra.mxu2 %v3101_v27 }
 0x67b   : > { %1428 = vmatpush.bf16.msra.mxu2 %v3093_v32 }
 0x67f   : > { %1429 = vmatpush.bf16.msra.mxu2 %v3085_v39 }
 0x683   : > { %1430 = vmatpush.bf16.msra.mxu2 %v3077_v45  ;;  %v3553_v45 = vld [vmem:[#allocation6 + $0x68] sm:$0xff] }
 0x684   : > { %1641 = vmatpush.bf16.msra.mxu1 %v3553_v45 }
 0x687   : > { %1431 = vmatpush.bf16.msra.mxu2 %v3069_v51  ;;  %v3550_v51 = vld [vmem:[#allocation6 + $0x50] sm:$0xff] }
 0x688   : > { %1642 = vmatpush.bf16.msra.mxu1 %v3552_v47 }
 0x68b   : > { %1432 = vmatpush.bf16.msra.mxu2 %v3061_v57  ;;  %v1343_v57 = vperm.slane %v1341_v11, 0 }
 0x68c   : > { %1643 = vmatpush.bf16.msra.mxu1 %v3551_v50 }
 0x68f   : > { %1433 = vmatpush.bf16.msra.mxu2 %v3053_v63 }
 0x690   : > { %1644 = vmatpush.bf16.msra.mxu1 %v3550_v51 }
 0x693   : > { %1434 = vmatpush.bf16.msra.mxu2 %v3045_v9 }
 0x694   : > { %1645 = vmatpush.bf16.msra.mxu1 %v3549_v53 }
 0x698   : > { %1646 = vmatpush.bf16.msra.mxu1 %v3548_v56 }
 0x6e1   : > { %v1275_v17 = vpop.xlane.xlu2 %1274 }
 0x6e2   : > { %v1278_v18 = vmul.f32 %v1275_v17, %v4035_v8 }
 0x6e4   : > { %v4128_v19 = vsub.f32 %v1270_v12, %v1278_v18  ;;  %v3049_v12 = vor.u32 %v3524_v5, %v3046_v6 }
 0x6e6   : > { %v1282_v20 = vmul.f32 %v4128_v19, %v4128_v19  ;;  %1448 = vmatpush.bf16.msrb.mxu3 %v3049_v12 }
 0x6e8   : > { %1284 = vadd.xlane.f32.xlu1 %v1282_v20 }
 0x6e9   : > { %v1277_v21 = vpop.xlane.xlu0 %1276 }
 0x6ea   : > { %v1279_v22 = vmul.f32 %v1277_v21, %v4035_v8 }
 0x6ec   : > { %v4133_v23 = vsub.f32 %v1271_v16, %v1279_v22 }
 0x6ee   : > { %v1283_v54 = vmul.f32 %v4133_v23, %v4133_v23 }
 0x6f0   : > { %1286 = vadd.xlane.f32.xlu2 %v1283_v54 }
 0x75b   : > { %v1285_v3 = vpop.xlane.xlu1 %1284 }
 0x75c   : > { %v1288_v7 = vmul.f32 %v1285_v3, %v4035_v8 }
 0x75e   : > { %v1290_v13 = vadd.f32 1e-12, %v1288_v7 }
 0x760   : > { %3720 = vrsqrt.f32 %v1290_v13  ;;  %vm1298_vm11 = vweird.f32 %v1290_v13 }
 0x763   : > { %v1287_v14 = vpop.xlane.xlu2 %1286 }
 0x764   : > { %v1289_v16 = vmul.f32 %v1287_v14, %v4035_v8 }
 0x766   : > { %v3721_v17 = vpop.eup %3720  ;;  %v1291_v18 = vadd.f32 1e-12, %v1289_v16 }
 0x767   : > { %v1293_v20 = vmul.f32 %v3721_v17, %v1290_v13  ;;  %vm1299_vm10 = vweird.f32 %v3721_v17 }
 0x768   : > { %3722 = vrsqrt.f32 %v1291_v18  ;;  %vm1300_vm12 = vmor %vm1298_vm11, %vm1299_vm10  ;;  %vm1308_vm14 = vweird.f32 %v1291_v18 }
 0x769   : > { %v1294_v21 = vmul.f32 %v3721_v17, %v1293_v20 }
 0x76b   : > { %v1295_v22 = vmul.f32 0.5, %v1294_v21 }
 0x76d   : > { %v1296_v54 = vsub.f32 1.5, %v1295_v22 }
 0x76e   : > { %v3723_v55 = vpop.eup %3722 }
 0x76f   : > { %v1297_v25 = vmul.f32 %v3721_v17, %v1296_v54  ;;  %v1303_v26 = vmul.f32 %v3723_v55, %v1291_v18  ;;  %vm1309_vm13 = vweird.f32 %v3723_v55 }
 0x770   : > { %vm1310_vm15 = vmor %vm1308_vm14, %vm1309_vm13 }
 0x771   : > { %v1304_v27 = vmul.f32 %v3723_v55, %v1303_v26  ;;  %v1301_v28 = vsel %vm1300_vm12, %v3721_v17, %v1297_v25 }
 0x772   : > { %v1312_v30 = vmul.f32 %v1301_v28, %v4128_v19 }
 0x773   : > { %v1305_v29 = vmul.f32 0.5, %v1304_v27 }
 0x774   : > { %v1317_v36 = vmul.f32 %v3686_v31, %v1312_v30 }
 0x775   : > { %v1306_v10 = vsub.f32 1.5, %v1305_v29 }
 0x776   : > { %v4243_v39 = vadd.f32 %v3687_v37, %v1317_v36 }
 0x777   : > { %v1307_v32 = vmul.f32 %v3723_v55, %v1306_v10 }
 0x779   : > { %v1311_v33 = vsel %vm1310_vm15, %v3723_v55, %v1307_v32 }
 0x77a   : > { %v1313_v35 = vmul.f32 %v1311_v33, %v4133_v23  ;;  %v3546_v23 = vld [vmem:[#allocation6 + $0x30] sm:$0xff] }
 0x77b   : > { %1626 = vmatpush.bf16.msrb.mxu0 %v3546_v23 }
 0x77c   : > { %v1318_v38 = vmul.f32 %v3686_v31, %v1313_v35 }
 0x77e   : > { %v4245_v40 = vadd.f32 %v3687_v37, %v1318_v38 }
 0x77f   : > { %1627 = vmatpush.bf16.msrb.mxu0 %v3545_v44 }
 0x780   : > { %v1324_v19 = vpack.c.bf16 %v4245_v40, %v4243_v39 }
 0x782   : > { %1435 = vmatmul.bf16.vlgmr.msra.gmra.mxu2 %v1324_v19  ;;  %1449 = vmatmul.bf16.vlgmr.msrb.gmra.mxu3 %v1324_v19 }
 0x783   : > { %1628 = vmatpush.bf16.msrb.mxu0 %v3544_v46  ;;  %v3688_v46 = vld [vmem:[%s4524_s13] ss:$0 sm:$0xff] }
 0x787   : > { %1629 = vmatpush.bf16.msrb.mxu0 %v3543_v48 }
 0x78b   : > { %1630 = vmatpush.bf16.msrb.mxu0 %v3542_v24 }
 0x78f   : > { %1631 = vmatpush.bf16.msrb.mxu0 %v3541_v52 }
 0x793   : > { %1632 = vmatpush.bf16.msrb.mxu0 %v3540_v15 }
 0x805   : > { %v1436_v59 = vpop.f32.mrf.mxu2  ;;  %v1450_v60 = vpop.f32.mrf.mxu3 }
 0x806   : > { %v1437_v61 = vadd.f32 %v1436_v59, %v1343_v57  ;;  %v1451_v62 = vadd.f32 %v1450_v60, %v1344_v58 }
 0x808   : > { %v1459_v63 = vmul.f32 0.044715, %v1437_v61  ;;  %v1460_v0 = vmul.f32 0.044715, %v1451_v62  ;;  %v1455_v33 = vmul.f32 0.5, %v1437_v61  ;;  %v1456_v37 = vmul.f32 0.5, %v1451_v62 }
 0x80a   : > { %v1463_v1 = vmul.f32 %v1459_v63, %v1437_v61  ;;  %v1464_v2 = vmul.f32 %v1460_v0, %v1451_v62  ;;  %v3578_v0 = vld [vmem:[#allocation2 + $0x170] sm:$0xf0] }
 0x80c   : > { %v1467_v3 = vmul.f32 %v1463_v1, %v1437_v61  ;;  %v1468_v4 = vmul.f32 %v1464_v2, %v1451_v62  ;;  %v3577_v1 = vld [vmem:[#allocation2 + $0x16c] sm:$0xf] }
 0x80d   : > { %v1438_v5 = vpop.f32.mrf.mxu2  ;;  %v1452_v6 = vpop.f32.mrf.mxu3 }
 0x80e   : > { %v1471_v7 = vadd.f32 %v1467_v3, %v1437_v61  ;;  %v1439_v9 = vadd.f32 %v1438_v5, %v1343_v57  ;;  %v1453_v12 = vadd.f32 %v1452_v6, %v1344_v58  ;;  %v1472_v13 = vadd.f32 %v1468_v4, %v1451_v62  ;;  %v3259_v3 = vld [vmem:[#allocation2 + $0x174] sm:$0xf0]  ;;  %v3265_v4 = vld [vmem:[#allocation2 + $0x170] sm:$0xf]  ;;  %v3579_v5 = vld [vmem:[#allocation2 + $0x178] sm:$0xf0] }
 0x80f   : > { %v3262_v6 = vor.u32 %v3577_v1, %v3259_v3 }
 0x810   : > { %v1461_v14 = vmul.f32 0.044715, %v1439_v9  ;;  %v1462_v16 = vmul.f32 0.044715, %v1453_v12  ;;  %v1475_v17 = vmul.f32 0.7978846, %v1471_v7  ;;  %v3266_v7 = vor.u32 %v3579_v5, %v3265_v4 }
 0x811   : > { %v1476_v20 = vmul.f32 0.7978846, %v1472_v13  ;;  %v1457_v35 = vmul.f32 0.5, %v1439_v9  ;;  %v1458_v38 = vmul.f32 0.5, %v1453_v12  ;;  %1892 = vmatpush.bf16.msra.mxu3 %v3262_v6  ;;  %v3574_v13 = vld [vmem:[#allocation2 + $0x154] sm:$0xf] }
 0x812   : > { %v1465_v18 = vmul.f32 %v1461_v14, %v1439_v9  ;;  %v1466_v21 = vmul.f32 %v1462_v16, %v1453_v12  ;;  %3724 = vtanh.f32 %v1475_v17  ;;  %1906 = vmatpush.bf16.msra.mxu0 %v3266_v7  ;;  %v3247_v16 = vld [vmem:[#allocation2 + $0x15c] sm:$0xf0]  ;;  %v3253_v17 = vld [vmem:[#allocation2 + $0x158] sm:$0xf]  ;;  %v3557_v5 = vld [vmem:[#allocation2 + $0xc8] sm:$0xf0] }
 0x813   : > { %3726 = vtanh.f32 %v1476_v20  ;;  %v3250_v20 = vor.u32 %v3574_v13, %v3247_v16  ;;  %v3173_v4 = vld [vmem:[#allocation2 + $0xc0] sm:$0xf]  ;;  %v3556_v6 = vld [vmem:[#allocation2 + $0xc4] sm:$0xf]  ;;  %v3181_v13 = vld [vmem:[#allocation2 + $0xc8] sm:$0xf] }
 0x814   : > { %v1469_v22 = vmul.f32 %v1465_v18, %v1439_v9  ;;  %v1470_v54 = vmul.f32 %v1466_v21, %v1453_v12  ;;  %v3576_v18 = vld [vmem:[#allocation2 + $0x160] sm:$0xf0] }
 0x815   : > { %v3254_v21 = vor.u32 %v3576_v18, %v3253_v17  ;;  %1893 = vmatpush.bf16.msra.mxu3 %v3250_v20 }
 0x816   : > { %v1473_v55 = vadd.f32 %v1469_v22, %v1439_v9  ;;  %v1474_v25 = vadd.f32 %v1470_v54, %v1453_v12  ;;  %v3245_v9 = vld [vmem:[#allocation2 + $0x150] sm:$0xf]  ;;  %v3575_v12 = vld [vmem:[#allocation2 + $0x158] sm:$0xf0]  ;;  %v3233_v22 = vld [vmem:[#allocation2 + $0x138] sm:$0xf] }
 0x817   : > { %v3246_v14 = vor.u32 %v3575_v12, %v3245_v9  ;;  %1907 = vmatpush.bf16.msra.mxu0 %v3254_v21  ;;  %v3572_v54 = vld [vmem:[#allocation2 + $0x140] sm:$0xf0]  ;;  %v3174_v9 = vor.u32 %v3557_v5, %v3173_v4  ;;  %v3175_v12 = vld [vmem:[#allocation2 + $0xcc] sm:$0xf0] }
 0x818   : > { %v1477_v26 = vmul.f32 0.7978846, %v1473_v55  ;;  %v1478_v27 = vmul.f32 0.7978846, %v1474_v25  ;;  %v3725_v28 = vpop.eup %3724  ;;  %v3571_v55 = vld [vmem:[#allocation2 + $0x13c] sm:$0xf]  ;;  %v3234_v25 = vor.u32 %v3572_v54, %v3233_v22  ;;  %v3178_v16 = vor.u32 %v3556_v6, %v3175_v12 }
 0x819   : > { %v3727_v29 = vpop.eup %3726  ;;  %v1483_v10 = vadd.f32 1.0, %v3725_v28  ;;  %v3573_v28 = vld [vmem:[#allocation2 + $0x148] sm:$0xf0] }
 0x81a   : > { %3728 = vtanh.f32 %v1477_v26  ;;  %v1484_v31 = vadd.f32 1.0, %v3727_v29  ;;  %v3235_v26 = vld [vmem:[#allocation2 + $0x144] sm:$0xf0] }
 0x81b   : > { %3730 = vtanh.f32 %v1478_v27  ;;  %v1487_v41 = vmul.f32 %v1483_v10, %v1455_v33  ;;  %v3241_v27 = vld [vmem:[#allocation2 + $0x140] sm:$0xf]  ;;  %v3238_v29 = vor.u32 %v3571_v55, %v3235_v26 }
 0x81c   : > { %v1488_v23 = vmul.f32 %v1484_v31, %v1456_v37  ;;  %v3242_v10 = vor.u32 %v3573_v28, %v3241_v27  ;;  %v3569_v31 = vld [vmem:[#allocation2 + $0x128] sm:$0xf0]  ;;  %v3570_v37 = vld [vmem:[#allocation2 + $0x130] sm:$0xf0] }
 0x81d   : > { %1894 = vmatpush.bf16.msra.mxu3 %v3238_v29 }
 0x81e   : > { %1908 = vmatpush.bf16.msra.mxu0 %v3242_v10 }
 0x820   : > { %v3729_v30 = vpop.eup %3728 }
 0x821   : > { %v3731_v32 = vpop.eup %3730  ;;  %v1485_v36 = vadd.f32 1.0, %v3729_v30  ;;  %v3221_v30 = vld [vmem:[#allocation2 + $0x120] sm:$0xf] }
 0x822   : > { %v1486_v19 = vadd.f32 1.0, %v3731_v32  ;;  %v3568_v32 = vld [vmem:[#allocation2 + $0x124] sm:$0xf]  ;;  %v3222_v33 = vor.u32 %v3569_v31, %v3221_v30 }
 0x823   : > { %v1489_v42 = vmul.f32 %v1485_v36, %v1457_v35  ;;  %v3223_v35 = vld [vmem:[#allocation2 + $0x12c] sm:$0xf0]  ;;  %v3229_v36 = vld [vmem:[#allocation2 + $0x128] sm:$0xf] }
 0x824   : > { %v1490_v43 = vmul.f32 %v1486_v19, %v1458_v38  ;;  %v3226_v38 = vor.u32 %v3568_v32, %v3223_v35  ;;  %v3230_v19 = vor.u32 %v3570_v37, %v3229_v36  ;;  %v3689_v36 = vld [vmem:[%s4525_s14] ss:$0 sm:$0xff] }
 0x825   : > { %v1491_v44 = vpack.c.bf16 %v1489_v42, %v1487_v41  ;;  %v3209_v41 = vld [vmem:[#allocation2 + $0x108] sm:$0xf]  ;;  %v3566_v42 = vld [vmem:[#allocation2 + $0x110] sm:$0xf0] }
 0x826   : > { %v1492_v45 = vpack.c.bf16 %v1490_v43, %v1488_v23  ;;  %1895 = vmatpush.bf16.msra.mxu3 %v3226_v38  ;;  %1909 = vmatpush.bf16.msra.mxu0 %v3230_v19  ;;  %v3565_v23 = vld [vmem:[#allocation2 + $0x10c] sm:$0xf]  ;;  %v3210_v43 = vor.u32 %v3566_v42, %v3209_v41  ;;  %v3690_v42 = vld [vmem:[%s4526_s15] ss:$0 sm:$0xff] }
 0x827   : > { %1633 = vmatmul.bf16.vlgmr.msrb.gmra.mxu0 %v1491_v44  ;;  %v3211_v44 = vld [vmem:[#allocation2 + $0x114] sm:$0xf0] }
 0x828   : > { %1647 = vmatmul.bf16.vlgmr.msra.gmra.mxu1 %v1492_v45  ;;  %v3217_v45 = vld [vmem:[#allocation2 + $0x110] sm:$0xf] }
 0x8a4   : > { %v1634_v47 = vpop.f32.mrf.mxu0 }
 0x8a5   : > { %v1635_v48 = vadd.f32 %v3688_v46, %v1634_v47  ;;  %v1648_v50 = vpop.f32.mrf.mxu1  ;;  %v3214_v47 = vor.u32 %v3565_v23, %v3211_v44 }
 0x8a7   : > { %v1649_v24 = vadd.f32 %v1648_v50, %v1635_v48  ;;  %1896 = vmatpush.bf16.msra.mxu3 %v3214_v47  ;;  %v3197_v50 = vld [vmem:[#allocation2 + $0xf0] sm:$0xf] }
 0x8a9   : > { %v1653_v51 = vadd.f32 %v1649_v24, %v4243_v39  ;;  %v3563_v24 = vld [vmem:[#allocation2 + $0xf8] sm:$0xf0] }
 0x8ab   : > { %1657 = vadd.xlane.f32.xlu0 %v1653_v51 }
 0x8ac   : > { %v1636_v52 = vpop.f32.mrf.mxu0 }
 0x8ad   : > { %v1637_v53 = vadd.f32 %v3688_v46, %v1636_v52  ;;  %v1650_v11 = vpop.f32.mrf.mxu1  ;;  %v3567_v46 = vld [vmem:[#allocation2 + $0x118] sm:$0xf0]  ;;  %v3198_v52 = vor.u32 %v3563_v24, %v3197_v50 }
 0x8ae   : > { %v3218_v48 = vor.u32 %v3567_v46, %v3217_v45 }
 0x8af   : > { %v1651_v15 = vadd.f32 %v1650_v11, %v1637_v53  ;;  %v3199_v53 = vld [vmem:[#allocation2 + $0xfc] sm:$0xf0]  ;;  %v3205_v11 = vld [vmem:[#allocation2 + $0xf8] sm:$0xf] }
 0x8b0   : > { %1910 = vmatpush.bf16.msra.mxu0 %v3218_v48 }
 0x8b1   : > { %v1654_v56 = vadd.f32 %v1651_v15, %v4245_v40  ;;  %v3257_v40 = vld [vmem:[#allocation2 + $0x168] sm:$0xf]  ;;  %v3564_v15 = vld [vmem:[#allocation2 + $0x100] sm:$0xf0] }
 0x8b2   : > { %v3258_v2 = vor.u32 %v3578_v0, %v3257_v40  ;;  %v3193_v40 = vld [vmem:[#allocation2 + $0xe0] sm:$0xf]  ;;  %v3561_v0 = vld [vmem:[#allocation2 + $0xe8] sm:$0xf0] }
 0x8b3   : > { %1659 = vadd.xlane.f32.xlu1 %v1654_v56  ;;  %v3194_v3 = vor.u32 %v3561_v0, %v3193_v40 }
 0x8b4   : > { %1878 = vmatpush.bf16.msrb.mxu2 %v3258_v2 }
 0x8b8   : > { %1879 = vmatpush.bf16.msrb.mxu2 %v3246_v14  ;;  %v3558_v14 = vld [vmem:[#allocation2 + $0xd0] sm:$0xf0] }
 0x8b9   : > { %v3182_v17 = vor.u32 %v3558_v14, %v3181_v13 }
 0x8bc   : > { %1880 = vmatpush.bf16.msrb.mxu2 %v3234_v25 }
 0x8c0   : > { %1881 = vmatpush.bf16.msrb.mxu2 %v3222_v33 }
 0x8c4   : > { %1882 = vmatpush.bf16.msrb.mxu2 %v3210_v43 }
 0x8c8   : > { %1883 = vmatpush.bf16.msrb.mxu2 %v3198_v52 }
 0x91e   : > { %v1658_v57 = vpop.xlane.xlu0 %1657 }
 0x91f   : > { %v1661_v58 = vmul.f32 %v1658_v57, %v4035_v8  ;;  %v3206_v57 = vor.u32 %v3564_v15, %v3205_v11 }
 0x921   : > { %v4258_v59 = vsub.f32 %v1653_v51, %v1661_v58  ;;  %v3562_v51 = vld [vmem:[#allocation2 + $0xf4] sm:$0xf]  ;;  %1911 = vmatpush.bf16.msra.mxu0 %v3206_v57  ;;  %v3185_v58 = vld [vmem:[#allocation2 + $0xd8] sm:$0xf] }
 0x923   : > { %v1665_v60 = vmul.f32 %v4258_v59, %v4258_v59 }
 0x925   : > { %1667 = vadd.xlane.f32.xlu2 %v1665_v60  ;;  %v3560_v60 = vld [vmem:[#allocation2 + $0xe0] sm:$0xf0]  ;;  %1912 = vmatpush.bf16.msra.mxu0 %v3194_v3 }
 0x926   : > { %v1660_v61 = vpop.xlane.xlu1 %1659 }
 0x927   : > { %v1662_v39 = vmul.f32 %v1660_v61, %v4035_v8  ;;  %v3559_v61 = vld [vmem:[#allocation2 + $0xdc] sm:$0xf] }
 0x929   : > { %v4263_v62 = vsub.f32 %v1654_v56, %v1662_v39  ;;  %v3202_v56 = vor.u32 %v3562_v51, %v3199_v53  ;;  %v3186_v39 = vor.u32 %v3560_v60, %v3185_v58  ;;  %1913 = vmatpush.bf16.msra.mxu0 %v3182_v17 }
 0x92b   : > { %v1666_v63 = vmul.f32 %v4263_v62, %v4263_v62  ;;  %1897 = vmatpush.bf16.msra.mxu3 %v3202_v56  ;;  %1884 = vmatpush.bf16.msrb.mxu2 %v3186_v39 }
 0x92d   : > { %1669 = vadd.xlane.f32.xlu0 %v1666_v63  ;;  %v3187_v63 = vld [vmem:[#allocation2 + $0xe4] sm:$0xf0] }
 0x92e   : > { %v3190_v2 = vor.u32 %v3559_v61, %v3187_v63 }
 0x92f   : > { %1885 = vmatpush.bf16.msrb.mxu2 %v3174_v9 }
 0x930   : > { %1898 = vmatpush.bf16.msra.mxu3 %v3190_v2 }
 0x934   : > { %1899 = vmatpush.bf16.msra.mxu3 %v3178_v16 }
 0x998   : > { %v1668_v1 = vpop.xlane.xlu2 %1667 }
 0x999   : > { %v1671_v7 = vmul.f32 %v1668_v1, %v4035_v8 }
 0x99b   : > { %v1673_v18 = vadd.f32 1e-12, %v1671_v7 }
 0x99d   : > { %3732 = vrsqrt.f32 %v1673_v18  ;;  %vm1681_vm1 = vweird.f32 %v1673_v18 }
 0x9a0   : > { %v1670_v20 = vpop.xlane.xlu0 %1669 }
 0x9a1   : > { %v1672_v21 = vmul.f32 %v1670_v20, %v4035_v8 }
 0x9a3   : > { %v3733_v22 = vpop.eup %3732  ;;  %v1674_v54 = vadd.f32 1e-12, %v1672_v21 }
 0x9a4   : > { %v1676_v55 = vmul.f32 %v3733_v22, %v1673_v18  ;;  %vm1682_vm0 = vweird.f32 %v3733_v22 }
 0x9a5   : > { %3734 = vrsqrt.f32 %v1674_v54  ;;  %vm1683_vm2 = vmor %vm1681_vm1, %vm1682_vm0  ;;  %vm1691_vm4 = vweird.f32 %v1674_v54 }
 0x9a6   : > { %v1677_v25 = vmul.f32 %v3733_v22, %v1676_v55 }
 0x9a8   : > { %v1678_v26 = vmul.f32 0.5, %v1677_v25 }
 0x9aa   : > { %v1679_v27 = vsub.f32 1.5, %v1678_v26 }
 0x9ab   : > { %v3735_v28 = vpop.eup %3734 }
 0x9ac   : > { %v1680_v29 = vmul.f32 %v3733_v22, %v1679_v27  ;;  %v1686_v10 = vmul.f32 %v3735_v28, %v1674_v54  ;;  %vm1692_vm3 = vweird.f32 %v3735_v28 }
 0x9ad   : > { %vm1693_vm5 = vmor %vm1691_vm4, %vm1692_vm3 }
 0x9ae   : > { %v1687_v30 = vmul.f32 %v3735_v28, %v1686_v10  ;;  %v1684_v31 = vsel %vm1683_vm2, %v3733_v22, %v1680_v29  ;;  %vm2731_vm2 = vcmask 1041409  }
 0x9af   : > { %v1695_v35 = vmul.f32 %v1684_v31, %v4258_v59 }
 0x9b0   : > { %v1688_v32 = vmul.f32 0.5, %v1687_v30 }
 0x9b1   : > { %v1700_v41 = vmul.f32 %v3689_v36, %v1695_v35 }
 0x9b2   : > { %v1689_v33 = vsub.f32 1.5, %v1688_v32 }
 0x9b3   : > { %v4277_v43 = vadd.f32 %v3690_v42, %v1700_v41 }
 0x9b4   : > { %v1690_v37 = vmul.f32 %v3735_v28, %v1689_v33 }
 0x9b6   : > { %v1694_v38 = vsel %vm1693_vm5, %v3735_v28, %v1690_v37 }
 0x9b7   : > { %v1696_v19 = vmul.f32 %v1694_v38, %v4263_v62  ;;  %v3170_v62 = vld [vmem:[%s4516_s5 + $0x3] sm:$0x7] }
 0x9b8   : > { %v1746_v45 = vperm.slane %v3170_v62, 2  ;;  %v1744_v48 = vperm.slane %v3170_v62, 0  ;;  %v1745_v50 = vperm.slane %v3170_v62, 1 }
 0x9b9   : > { %v1701_v23 = vmul.f32 %v3689_v36, %v1696_v19 }
 0x9bb   : > { %v4279_v44 = vadd.f32 %v3690_v42, %v1701_v23 }
 0x9bd   : > { %v1707_v59 = vpack.c.bf16 %v4279_v44, %v4277_v43 }
 0x9bf   : > { %1886 = vmatmul.bf16.vlgmr.msrb.gmra.mxu2 %v1707_v59  ;;  %1900 = vmatmul.bf16.vlgmr.msra.gmra.mxu3 %v1707_v59 }
 0x9c0   : > { %1914 = vmatmul.bf16.vlgmr.msra.gmra.mxu0 %v1707_v59 }
 0xa3d   : > { %v1915_v46 = vpop.f32.mrf.mxu0 }
 0xa3e   : > { %v1916_v47 = vadd.f32 %v1915_v46, %v1746_v45 }
 0xa40   : > { %v4286_v24 = vpack.c.bf16 %v1916_v47, %v1916_v47 }
 0xa42   : > { %v1996_v51 = vsel %vm1007_vm8, %v4286_v24, 0  ;;  %v1887_v52 = vpop.f32.mrf.mxu2  ;;  %v1901_v53 = vpop.f32.mrf.mxu3 }
 0xa43   : > { %v1888_v11 = vadd.f32 %v1887_v52, %v1744_v48  ;;  %v1902_v15 = vadd.f32 %v1901_v53, %v1745_v50  ;;  %2005 = vmatpush.bf16.msrb.mxu3 %v1996_v51 }
 0xa45   : > { %v1920_v56 = vpack.c.bf16 %v1888_v11, %v1888_v11  ;;  %v1922_v57 = vpack.c.bf16 %v1902_v15, %v1902_v15  ;;  %v1917_v58 = vpop.f32.mrf.mxu0  ;;  %v2117_v15 = vunpack.c.l.b16 %v4286_v24 }
 0xa46   : > { %v1918_v60 = vadd.f32 %v1917_v58, %v1746_v45 }
 0xa47   : > { %v2031_v61 = vunpack.c.l.b16 %v1920_v56  ;;  %v1930_v39 = vsel %vm930_vm7, %v1922_v57, 0  ;;  %v2036_v63 = vunpack.c.l.b16 %v1922_v57 }
 0xa48   : > { %v4291_v40 = vpack.c.bf16 %v1918_v60, %v1918_v60  ;;  %1939 = vmatpush.bf16.xpose.msrb.mxu1 %v1930_v39 }
 0xa49   : > { %v2032_v0 = vpack.c.b16 %v2031_v61, %v2031_v61  ;;  %v2037_v1 = vpack.c.b16 %v2036_v63, %v2036_v63 }
 0xa4a   : > { %v2015_v2 = vsel %vm1007_vm8, %v4291_v40, 0  ;;  %v1889_v3 = vpop.f32.mrf.mxu2  ;;  %v1903_v4 = vpop.f32.mrf.mxu3 }
 0xa4b   : > { %v1890_v5 = vadd.f32 %v1889_v3, %v1744_v48  ;;  %v1904_v6 = vadd.f32 %v1903_v4, %v1745_v50  ;;  %2024 = vmatpush.bf16.msrb.mxu0 %v2015_v2  ;;  %2038 = vrot.lane.b32.xlu1 %v2037_v1, %s3884_s1 }
 0xa4c   : > { %2033 = vrot.lane.b32.xlu0 %v2032_v0, %s3884_s1 }
 0xa4d   : > { %v1921_v7 = vpack.c.bf16 %v1890_v5, %v1890_v5  ;;  %v1923_v9 = vpack.c.bf16 %v1904_v6, %v1904_v6 }
 0xa4f   : > { %v2060_v12 = vunpack.c.l.b16 %v1921_v7  ;;  %v1949_v13 = vsel %vm930_vm7, %v1923_v9, 0  ;;  %v2065_v14 = vunpack.c.l.b16 %v1923_v9  ;;  %3267 = vmatmul.msk.bf16.vlgmr.msrb.gmra.mxu1 %vm930_vm7, %v1920_v56  ;;  %v2118_v56 = vpack.c.b16 %v2117_v15, %v2117_v15 }
 0xa50   : > { %1958 = vmatpush.bf16.xpose.msra.mxu2 %v1949_v13 }
 0xa51   : > { %v2061_v16 = vpack.c.b16 %v2060_v12, %v2060_v12  ;;  %v2066_v17 = vpack.c.b16 %v2065_v14, %v2065_v14 }
 0xa53   : > { %2067 = vrot.lane.b32.xlu2 %v2066_v17, %s3884_s1  ;;  %2062 = vrot.lane.b32.xlu1 %v2061_v16, %s3884_s1 }
 0xa57   : > { %3268 = vmatmul.msk.bf16.vlgmr.msra.gmra.mxu2 %vm930_vm7, %v1921_v7  ;;  %v2141_v7 = vunpack.c.l.b16 %v4291_v40 }
 0xa59   : > { %v2142_v12 = vpack.c.b16 %v2141_v7, %v2141_v7  ;;  %v3600_v7 = vld [vmem:[%s4521_s10 + $0xe4] sm:$0xf] }
 0xaad   : > { %v2068_v18 = vpop.permute.xlu2 %2067 }
 0xaae   : > { %v2073_v20 = vsel %vm930_vm7, %v2068_v18, 0 }
 0xaaf   : > { %2082 = vmatpush.bf16.xpose.msrb.mxu2 %v2073_v20 }
 0xabd   : > { %v2039_v21 = vpop.permute.xlu1 %2038 }
 0xabe   : > { %v2044_v22 = vsel %vm930_vm7, %v2039_v21, 0  ;;  %v2034_v54 = vpop.permute.xlu0 %2033 }
 0xabf   : > { %2053 = vmatpush.bf16.xpose.msra.mxu1 %v2044_v22 }
 0xac5   : > { %v2063_v55 = vpop.permute.xlu1 %2062 }
 0xac6   : > { %3271 = vmatmul.msk.bf16.vlgmr.msra.gmra.mxu1 %vm930_vm7, %v2034_v54  ;;  %3272 = vmatmul.msk.bf16.vlgmr.msrb.gmra.mxu2 %vm930_vm7, %v2063_v55 }
 0xacc   : > { %v1941_v25 = vpop.f32.mrf.mxu1 }
 0xacd   : > { %v1964_v26 = vmul.f32 0.125, %v1941_v25 }
 0xacf   : > { %v1966_v27 = vadd.f32 %v1964_v26, %v4088_v34 }
 0xad1   : > { %v1968_v28 = vsel %vm979_vm9, %v1966_v27, -inf }
 0xad2   : > { %1969 = vmax.xlane.f32.xlu0 %v1968_v28 }
 0xad4   : > { %v1943_v29 = vpop.f32.mrf.mxu1 }
 0xada   : > { %v1960_v10 = vpop.f32.mrf.mxu2 }
 0xadb   : > { %v1965_v30 = vmul.f32 0.125, %v1960_v10 }
 0xadd   : > { %v1967_v31 = vadd.f32 %v1965_v30, %v4092_v49 }
 0xadf   : > { %v1971_v32 = vsel %vm979_vm9, %v1967_v31, -inf }
 0xae0   : > { %1972 = vmax.xlane.f32.xlu2 %v1971_v32  ;;  %v3586_v32 = vld [vmem:[#allocation4 + $0x70] sm:$0xff] }
 0xae2   : > { %v1962_v33 = vpop.f32.mrf.mxu2 }
 0xae3   : > { %v3585_v33 = vld [vmem:[#allocation4 + $0x68] sm:$0xff] }
 0xb43   : > { %v2055_v35 = vpop.f32.mrf.mxu1 }
 0xb44   : > { %v2088_v36 = vmul.f32 0.125, %v2055_v35  ;;  %v3584_v35 = vld [vmem:[#allocation4 + $0x60] sm:$0xff] }
 0xb45   : > { %v1970_v37 = vpop.xlane.xlu0 %1969 }
 0xb46   : > { %v1974_v38 = vsub.f32 %v1966_v27, %v1970_v37  ;;  %v2090_v19 = vadd.f32 %v2088_v36, %v4088_v34  ;;  %v3583_v36 = vld [vmem:[#allocation4 + $0x58] sm:$0xff] }
 0xb48   : > { %v1976_v41 = vmul.f32 1.442695, %v1974_v38  ;;  %v2092_v42 = vsel %vm979_vm9, %v2090_v19, -inf  ;;  %v3582_v38 = vld [vmem:[#allocation4 + $0x50] sm:$0xff] }
 0xb49   : > { %v2084_v23 = vpop.f32.mrf.mxu2  ;;  %2093 = vmax.xlane.f32.xlu1 %v2092_v42 }
 0xb4a   : > { %3736 = vpow2.f32 %v1976_v41  ;;  %v2089_v59 = vmul.f32 0.125, %v2084_v23 }
 0xb4b   : > { %v2057_v62 = vpop.f32.mrf.mxu1 }
 0xb4c   : > { %v2091_v45 = vadd.f32 %v2089_v59, %v4092_v49  ;;  %v3580_v62 = vld [vmem:[#allocation4 + $0x40] sm:$0xff] }
 0xb4e   : > { %v2095_v46 = vsel %vm979_vm9, %v2091_v45, -inf }
 0xb4f   : > { %2096 = vmax.xlane.f32.xlu0 %v2095_v46 }
 0xb50   : > { %v3737_v47 = vpop.eup %3736 }
 0xb51   : > { %v2086_v48 = vpop.f32.mrf.mxu2  ;;  %v1980_v50 = vsel %vm979_vm9, %v3737_v47, 0.0 }
 0xb52   : > { %1981 = vadd.xlane.f32.xlu2 %v1980_v50 }
 0xb53   : > { %v1973_v51 = vpop.xlane.xlu2 %1972 }
 0xb54   : > { %v1975_v34 = vsub.f32 %v1967_v31, %v1973_v51  ;;  %v3587_v31 = vld [vmem:[#allocation4 + $0x78] sm:$0xff] }
 0xb55   : > { %2245 = vmatpush.bf16.msrb.mxu1 %v3587_v31 }
 0xb56   : > { %v1978_v52 = vmul.f32 1.442695, %v1975_v34  ;;  %v3691_v34 = vld [vmem:[%s4518_s7 + $0x1] ss:$0 sm:$0xff] }
 0xb58   : > { %3738 = vpow2.f32 %v1978_v52 }
 0xb59   : > { %2246 = vmatpush.bf16.msrb.mxu1 %v3586_v32  ;;  %v3345_v32 = vld [vmem:[%s4521_s10 + $0xa0] sm:$0xf] }
 0xb5d   : > { %2247 = vmatpush.bf16.msrb.mxu1 %v3585_v33  ;;  %v3593_v33 = vld [vmem:[%s4521_s10 + $0xa4] sm:$0xf0] }
 0xb5e   : > { %v3739_v53 = vpop.eup %3738 }
 0xb5f   : > { %v1983_v11 = vsel %vm979_vm9, %v3739_v53, 0.0 }
 0xb60   : > { %1984 = vadd.xlane.f32.xlu1 %v1983_v11 }
 0xb61   : > { %2248 = vmatpush.bf16.msrb.mxu1 %v3584_v35  ;;  %v3592_v35 = vld [vmem:[%s4521_s10 + $0xa4] sm:$0xf] }
 0xb65   : > { %2249 = vmatpush.bf16.msrb.mxu1 %v3583_v36  ;;  %v3346_v36 = vor.u32 %v3593_v33, %v3345_v32  ;;  %v3612_v32 = vld [vmem:[#allocation6 + $0xc0] sm:$0xff] }
 0xb69   : > { %2250 = vmatpush.bf16.msrb.mxu1 %v3582_v38 }
 0xb79   : > { %2119 = vrot.lane.b32.xlu1 %v2118_v56, %s3884_s1 }
 0xbbc   : > { %v2094_v49 = vpop.xlane.xlu1 %2093 }
 0xbbd   : > { %v2098_v57 = vsub.f32 %v2090_v19, %v2094_v49  ;;  %v3581_v19 = vld [vmem:[#allocation4 + $0x48] sm:$0xff] }
 0xbbe   : > { %2251 = vmatpush.bf16.msrb.mxu1 %v3581_v19  ;;  %v3337_v19 = vld [vmem:[%s4521_s10 + $0x90] sm:$0xf] }
 0xbbf   : > { %v2100_v58 = vmul.f32 1.442695, %v2098_v57 }
 0xbc1   : > { %3740 = vpow2.f32 %v2100_v58 }
 0xbc2   : > { %v2097_v60 = vpop.xlane.xlu0 %2096  ;;  %2252 = vmatpush.bf16.msrb.mxu1 %v3580_v62  ;;  %v3329_v62 = vld [vmem:[%s4521_s10 + $0x80] sm:$0xf] }
 0xbc3   : > { %v2099_v61 = vsub.f32 %v2091_v45, %v2097_v60 }
 0xbc5   : > { %v2102_v39 = vmul.f32 1.442695, %v2099_v61  ;;  %v1982_v63 = vpop.xlane.xlu2 %1981 }
 0xbc6   : > { %3742 = vrcp.f32 %v1982_v63 }
 0xbc7   : > { %v3741_v0 = vpop.eup %3740  ;;  %3744 = vpow2.f32 %v2102_v39 }
 0xbc8   : > { %v2104_v1 = vsel %vm979_vm9, %v3741_v0, 0.0 }
 0xbc9   : > { %2105 = vadd.xlane.f32.xlu0 %v2104_v1  ;;  %v3603_v1 = vld [vmem:[%s4521_s10 + $0xf4] sm:$0xf0] }
 0xbcc   : > { %v3743_v2 = vpop.eup %3742 }
 0xbcd   : > { %v3745_v3 = vpop.eup %3744  ;;  %v1988_v24 = vmul.f32 %v3743_v2, %v3737_v47  ;;  %v3602_v2 = vld [vmem:[%s4521_s10 + $0xf4] sm:$0xf] }
 0xbce   : > { %v2107_v4 = vsel %vm979_vm9, %v3745_v3, 0.0 }
 0xbcf   : > { %v1990_v5 = vpack.c.bf16 %v1988_v24, %v1988_v24  ;;  %2108 = vadd.xlane.f32.xlu2 %v2107_v4  ;;  %v3387_v24 = vld [vmem:[%s4521_s10 + $0xf8] sm:$0xf0] }
 0xbd0   : > { %v3390_v4 = vor.u32 %v3602_v2, %v3387_v24 }
 0xbd1   : > { %3269 = vmatmul.msk.bf16.vlgmr.msrb.gmra.mxu3 %vm979_vm9, %v1990_v5  ;;  %v3377_v5 = vld [vmem:[%s4521_s10 + $0xe0] sm:$0xf] }
 0xbd3   : > { %v1985_v6 = vpop.xlane.xlu1 %1984 }
 0xbd4   : > { %3746 = vrcp.f32 %v1985_v6  ;;  %v3601_v6 = vld [vmem:[%s4521_s10 + $0xe4] sm:$0xf0] }
 0xbda   : > { %v3747_v9 = vpop.eup %3746 }
 0xbdb   : > { %v1989_v13 = vmul.f32 %v3747_v9, %v3739_v53  ;;  %v3378_v9 = vor.u32 %v3601_v6, %v3377_v5  ;;  %v3692_v5 = vld [vmem:[%s4519_s8 + $0x1] ss:$0 sm:$0xff] }
 0xbdd   : > { %v1991_v14 = vpack.c.bf16 %v1989_v13, %v1989_v13  ;;  %2143 = vrot.lane.b32.xlu0 %v2142_v12, %s3884_s1  ;;  %v3379_v12 = vld [vmem:[%s4521_s10 + $0xe8] sm:$0xf0] }
 0xbde   : > { %v3382_v13 = vor.u32 %v3600_v7, %v3379_v12 }
 0xbdf   : > { %3270 = vmatmul.msk.bf16.vlgmr.msrb.gmra.mxu0 %vm979_vm9, %v1991_v14  ;;  %v3369_v14 = vld [vmem:[%s4521_s10 + $0xd0] sm:$0xf] }
 0xbeb   : > { %v2120_v16 = vpop.permute.xlu1 %2119 }
 0xbec   : > { %v2125_v17 = vsel %vm1007_vm8, %v2120_v16, 0  ;;  %v3599_v16 = vld [vmem:[%s4521_s10 + $0xd4] sm:$0xf0] }
 0xbed   : > { %2134 = vmatpush.bf16.msra.mxu3 %v2125_v17  ;;  %v3598_v17 = vld [vmem:[%s4521_s10 + $0xd4] sm:$0xf] }
 0xbf1   : > { %2434 = vmatpush.bf16.msrb.mxu3 %v3390_v4 }
 0xbf5   : > { %2435 = vmatpush.bf16.msrb.mxu3 %v3382_v13  ;;  %v3693_v13 = vld [vmem:[%s4520_s9 + $0x1] ss:$0 sm:$0xff] }
 0xc3c   : > { %v2106_v18 = vpop.xlane.xlu0 %2105 }
 0xc3d   : > { %3748 = vrcp.f32 %v2106_v18  ;;  %v3370_v18 = vor.u32 %v3599_v16, %v3369_v14 }
 0xc42   : > { %v2109_v20 = vpop.xlane.xlu2 %2108 }
 0xc43   : > { %v3749_v21 = vpop.eup %3748  ;;  %3750 = vrcp.f32 %v2109_v20  ;;  %v3371_v20 = vld [vmem:[%s4521_s10 + $0xd8] sm:$0xf0] }
 0xc44   : > { %v2112_v22 = vmul.f32 %v3749_v21, %v3741_v0  ;;  %v3374_v21 = vor.u32 %v3598_v17, %v3371_v20  ;;  %v3619_v20 = vld [vmem:[#allocation6 + $0xf8] sm:$0xff] }
 0xc45   : > { %2634 = vmatpush.bf16.msra.mxu1 %v3619_v20 }
 0xc46   : > { %v2114_v54 = vpack.c.bf16 %v2112_v22, %v2112_v22  ;;  %2436 = vmatpush.bf16.msrb.mxu3 %v3374_v21  ;;  %v3361_v22 = vld [vmem:[%s4521_s10 + $0xc0] sm:$0xf]  ;;  %v3618_v21 = vld [vmem:[#allocation6 + $0xf0] sm:$0xff] }
 0xc48   : > { %3273 = vmatmul.msk.bf16.vlgmr.msra.gmra.mxu3 %vm979_vm9, %v2114_v54  ;;  %v3597_v54 = vld [vmem:[%s4521_s10 + $0xc4] sm:$0xf0] }
 0xc49   : > { %v3751_v40 = vpop.eup %3750  ;;  %2635 = vmatpush.bf16.msra.mxu1 %v3618_v21 }
 0xc4a   : > { %v2113_v55 = vmul.f32 %v3751_v40, %v3745_v3  ;;  %v3596_v40 = vld [vmem:[%s4521_s10 + $0xc4] sm:$0xf] }
 0xc4c   : > { %v2115_v27 = vpack.c.bf16 %v2113_v55, %v2113_v55  ;;  %v3362_v55 = vor.u32 %v3597_v54, %v3361_v22  ;;  %v3609_v22 = vld [vmem:[#allocation6 + $0xa8] sm:$0xff] }
 0xc4d   : > { %v3617_v54 = vld [vmem:[#allocation6 + $0xe8] sm:$0xff] }
 0xc4e   : > { %2636 = vmatpush.bf16.msra.mxu1 %v3617_v54 }
 0xc4f   : > { %v2144_v25 = vpop.permute.xlu0 %2143 }
 0xc50   : > { %v2149_v26 = vsel %vm1007_vm8, %v2144_v25, 0  ;;  %v3363_v25 = vld [vmem:[%s4521_s10 + $0xc8] sm:$0xf0] }
 0xc51   : > { %2158 = vmatpush.bf16.msra.mxu0 %v2149_v26  ;;  %v3366_v26 = vor.u32 %v3596_v40, %v3363_v25  ;;  %v3608_v40 = vld [vmem:[#allocation6 + $0xa0] sm:$0xff]  ;;  %v3607_v25 = vld [vmem:[#allocation6 + $0x98] sm:$0xff] }
 0xc53   : > { %2437 = vmatpush.bf16.msrb.mxu3 %v3366_v26  ;;  %v3615_v26 = vld [vmem:[#allocation6 + $0xd8] sm:$0xff] }
 0xc54   : > { %v2007_v28 = vpop.f32.mrf.mxu3  ;;  %3274 = vmatmul.msk.bf16.vlgmr.msra.gmra.mxu0 %vm979_vm9, %v2115_v27  ;;  %v3353_v27 = vld [vmem:[%s4521_s10 + $0xb0] sm:$0xf] }
 0xc5c   : > { %v2009_v29 = vpop.f32.mrf.mxu3  ;;  %v2026_v10 = vpop.f32.mrf.mxu0 }
 0xc5d   : > { %v3594_v29 = vld [vmem:[%s4521_s10 + $0xb4] sm:$0xf] }
 0xc64   : > { %v2028_v30 = vpop.f32.mrf.mxu0 }
 0xc65   : > { %v3355_v30 = vld [vmem:[%s4521_s10 + $0xb8] sm:$0xf0] }
 0xc66   : > { %v3358_v31 = vor.u32 %v3594_v29, %v3355_v30  ;;  %v3605_v29 = vld [vmem:[#allocation6 + $0x88] sm:$0xff]  ;;  %v3326_v30 = vld [vmem:[%s4522_s11 + $0x2] sm:$0x3] }
 0xc67   : > { %v2336_v33 = vperm.slane %v3326_v30, 0 }
 0xc68   : > { %2438 = vmatpush.bf16.msrb.mxu3 %v3358_v31  ;;  %v3604_v31 = vld [vmem:[#allocation6 + $0x80] sm:$0xff] }
 0xccb   : > { %v2136_v37 = vpop.f32.mrf.mxu3 }
 0xcd1   : > { %v2160_v41 = vpop.f32.mrf.mxu0 }
 0xcd2   : > { %v3678_v42 = vpack.i.bf16 %v2160_v41, %v2136_v37  ;;  %v3347_v37 = vld [vmem:[%s4521_s10 + $0xa8] sm:$0xf0]  ;;  %v3591_v41 = vld [vmem:[%s4521_s10 + $0x94] sm:$0xf0] }
 0xcd3   : > { %v2138_v23 = vpop.f32.mrf.mxu3  ;;  %v3350_v38 = vor.u32 %v3592_v35, %v3347_v37  ;;  %v2337_v35 = vperm.slane %v3326_v30, 1 }
 0xcd4   : > { %3679 = vrot.lane.b32.xlu2 %v3678_v42, %s3884_s1  ;;  %v3590_v42 = vld [vmem:[%s4521_s10 + $0x94] sm:$0xf]  ;;  %v3338_v23 = vor.u32 %v3591_v41, %v3337_v19 }
 0xcd5   : > { %2439 = vmatpush.bf16.msrb.mxu3 %v3350_v38 }
 0xcd9   : > { %v2162_v59 = vpop.f32.mrf.mxu0 }
 0xcda   : > { %v3339_v59 = vld [vmem:[%s4521_s10 + $0x98] sm:$0xf0] }
 0xd2e   : > { %v3680_v45 = vpop.permute.xlu2 %3679 }
 0xd2f   : > { %v3682_v46 = vunpack.i.h.bf16 %v3680_v45  ;;  %v3681_v47 = vunpack.i.l.bf16 %v3680_v45  ;;  %v3589_v45 = vld [vmem:[%s4521_s10 + $0x84] sm:$0xf0] }
 0xd31   : > { %v2173_v48 = vsel %vm930_vm7, %v2026_v10, %v3682_v46  ;;  %v2172_v50 = vsel %vm930_vm7, %v2007_v28, %v3681_v47  ;;  %v3595_v28 = vld [vmem:[%s4521_s10 + $0xb4] sm:$0xf0]  ;;  %v3342_v47 = vor.u32 %v3590_v42, %v3339_v59 }
 0xd32   : > { %v2174_v51 = vpack.c.bf16 %v2173_v48, %v2172_v50  ;;  %v3354_v10 = vor.u32 %v3595_v28, %v3353_v27  ;;  %v3588_v48 = vld [vmem:[%s4521_s10 + $0x84] sm:$0xf]  ;;  %v3331_v50 = vld [vmem:[%s4521_s10 + $0x88] sm:$0xf0]  ;;  %v3606_v27 = vld [vmem:[#allocation6 + $0x90] sm:$0xff] }
 0xd33   : > { %2440 = vmatpush.bf16.msrb.mxu3 %v3342_v47  ;;  %v3614_v28 = vld [vmem:[#allocation6 + $0xd0] sm:$0xff] }
 0xd34   : > { %2253 = vmatmul.bf16.vlgmr.msrb.gmra.mxu1 %v2174_v51 }
 0xdb1   : > { %v2254_v52 = vpop.f32.mrf.mxu1 }
 0xdb2   : > { %v2255_v53 = vadd.f32 %v3691_v34, %v2254_v52  ;;  %v3334_v52 = vor.u32 %v3588_v48, %v3331_v50 }
 0xdb4   : > { %v2259_v11 = vadd.f32 %v2255_v53, %v4277_v43  ;;  %2441 = vmatpush.bf16.msrb.mxu3 %v3334_v52 }
 0xdb6   : > { %2265 = vadd.xlane.f32.xlu0 %v2259_v11 }
 0xdb9   : > { %v2256_v15 = vpop.f32.mrf.mxu1 }
 0xdba   : > { %v2257_v56 = vadd.f32 %v3691_v34, %v2256_v15  ;;  %v3330_v34 = vor.u32 %v3589_v45, %v3329_v62 }
 0xdbc   : > { %v2260_v49 = vadd.f32 %v2257_v56, %v4279_v44  ;;  %v3385_v44 = vld [vmem:[%s4521_s10 + $0xf0] sm:$0xf] }
 0xdbd   : > { %v3386_v3 = vor.u32 %v3603_v1, %v3385_v44 }
 0xdbe   : > { %2267 = vadd.xlane.f32.xlu1 %v2260_v49 }
 0xdbf   : > { %2420 = vmatpush.bf16.msra.mxu2 %v3386_v3 }
 0xdc3   : > { %2421 = vmatpush.bf16.msra.mxu2 %v3378_v9 }
 0xdc7   : > { %2422 = vmatpush.bf16.msra.mxu2 %v3370_v18  ;;  %v3611_v18 = vld [vmem:[#allocation6 + $0xb8] sm:$0xff] }
 0xdc8   : > { %2620 = vmatpush.bf16.msrb.mxu0 %v3611_v18 }
 0xdcb   : > { %2423 = vmatpush.bf16.msra.mxu2 %v3362_v55  ;;  %v3616_v55 = vld [vmem:[#allocation6 + $0xe0] sm:$0xff] }
 0xdcc   : > { %2637 = vmatpush.bf16.msra.mxu1 %v3616_v55 }
 0xdcf   : > { %2424 = vmatpush.bf16.msra.mxu2 %v3354_v10  ;;  %v3613_v10 = vld [vmem:[#allocation6 + $0xc8] sm:$0xff] }
 0xdd0   : > { %2638 = vmatpush.bf16.msra.mxu1 %v3615_v26 }
 0xdd3   : > { %2425 = vmatpush.bf16.msra.mxu2 %v3346_v36 }
 0xdd4   : > { %2639 = vmatpush.bf16.msra.mxu1 %v3614_v28 }
 0xdd7   : > { %2426 = vmatpush.bf16.msra.mxu2 %v3338_v23 }
 0xdd8   : > { %2640 = vmatpush.bf16.msra.mxu1 %v3613_v10 }
 0xddb   : > { %2427 = vmatpush.bf16.msra.mxu2 %v3330_v34 }
 0xddc   : > { %2641 = vmatpush.bf16.msra.mxu1 %v3612_v32 }
 0xe29   : > { %v2266_v57 = vpop.xlane.xlu0 %2265 }
 0xe2a   : > { %v2269_v58 = vmul.f32 %v2266_v57, %v4035_v8 }
 0xe2c   : > { %v4337_v60 = vsub.f32 %v2259_v11, %v2269_v58 }
 0xe2e   : > { %v2273_v61 = vmul.f32 %v4337_v60, %v4337_v60 }
 0xe30   : > { %2275 = vadd.xlane.f32.xlu2 %v2273_v61 }
 0xe31   : > { %v2268_v39 = vpop.xlane.xlu1 %2267 }
 0xe32   : > { %v2270_v63 = vmul.f32 %v2268_v39, %v4035_v8 }
 0xe34   : > { %v4342_v0 = vsub.f32 %v2260_v49, %v2270_v63 }
 0xe36   : > { %v2274_v43 = vmul.f32 %v4342_v0, %v4342_v0 }
 0xe38   : > { %2277 = vadd.xlane.f32.xlu0 %v2274_v43 }
 0xea3   : > { %v2276_v46 = vpop.xlane.xlu2 %2275 }
 0xea4   : > { %v2279_v51 = vmul.f32 %v2276_v46, %v4035_v8 }
 0xea6   : > { %v2281_v53 = vadd.f32 1e-12, %v2279_v51 }
 0xea8   : > { %3752 = vrsqrt.f32 %v2281_v53  ;;  %vm2289_vm7 = vweird.f32 %v2281_v53 }
 0xeab   : > { %v2278_v11 = vpop.xlane.xlu0 %2277 }
 0xeac   : > { %v2280_v15 = vmul.f32 %v2278_v11, %v4035_v8 }
 0xeae   : > { %v3753_v56 = vpop.eup %3752  ;;  %v2282_v49 = vadd.f32 1e-12, %v2280_v15 }
 0xeaf   : > { %v2284_v57 = vmul.f32 %v3753_v56, %v2281_v53  ;;  %vm2290_vm6 = vweird.f32 %v3753_v56 }
 0xeb0   : > { %3754 = vrsqrt.f32 %v2282_v49  ;;  %vm2291_vm8 = vmor %vm2289_vm7, %vm2290_vm6  ;;  %vm2299_vm10 = vweird.f32 %v2282_v49 }
 0xeb1   : > { %v2285_v58 = vmul.f32 %v3753_v56, %v2284_v57 }
 0xeb3   : > { %v2286_v61 = vmul.f32 0.5, %v2285_v58 }
 0xeb5   : > { %v2287_v39 = vsub.f32 1.5, %v2286_v61 }
 0xeb6   : > { %v3755_v63 = vpop.eup %3754 }
 0xeb7   : > { %v2288_v43 = vmul.f32 %v3753_v56, %v2287_v39  ;;  %v2294_v44 = vmul.f32 %v3755_v63, %v2282_v49  ;;  %vm2300_vm9 = vweird.f32 %v3755_v63 }
 0xeb8   : > { %vm2301_vm11 = vmor %vm2299_vm10, %vm2300_vm9 }
 0xeb9   : > { %v2295_v1 = vmul.f32 %v3755_v63, %v2294_v44  ;;  %v2292_v2 = vsel %vm2291_vm8, %v3753_v56, %v2288_v43 }
 0xeba   : > { %v2303_v4 = vmul.f32 %v2292_v2, %v4337_v60 }
 0xebb   : > { %v2296_v3 = vmul.f32 0.5, %v2295_v1 }
 0xebc   : > { %v2308_v12 = vmul.f32 %v3692_v5, %v2303_v4 }
 0xebd   : > { %v2297_v24 = vsub.f32 1.5, %v2296_v3 }
 0xebe   : > { %v4452_v16 = vadd.f32 %v3693_v13, %v2308_v12 }
 0xebf   : > { %v2298_v6 = vmul.f32 %v3755_v63, %v2297_v24 }
 0xec1   : > { %v2302_v7 = vsel %vm2301_vm11, %v3755_v63, %v2298_v6 }
 0xec2   : > { %v2304_v9 = vmul.f32 %v2302_v7, %v4342_v0  ;;  %v3610_v0 = vld [vmem:[#allocation6 + $0xb0] sm:$0xff] }
 0xec3   : > { %2621 = vmatpush.bf16.msrb.mxu0 %v3610_v0 }
 0xec4   : > { %v2309_v14 = vmul.f32 %v3692_v5, %v2304_v9 }
 0xec6   : > { %v4454_v17 = vadd.f32 %v3693_v13, %v2309_v14 }
 0xec7   : > { %2622 = vmatpush.bf16.msrb.mxu0 %v3609_v22  ;;  %v3694_v22 = vld [vmem:[%s4524_s13 + $0x1] ss:$0 sm:$0xff] }
 0xec8   : > { %v2315_v60 = vpack.c.bf16 %v4454_v17, %v4452_v16 }
 0xeca   : > { %2428 = vmatmul.bf16.vlgmr.msra.gmra.mxu2 %v2315_v60  ;;  %2442 = vmatmul.bf16.vlgmr.msrb.gmra.mxu3 %v2315_v60 }
 0xecb   : > { %2623 = vmatpush.bf16.msrb.mxu0 %v3608_v40 }
 0xecf   : > { %2624 = vmatpush.bf16.msrb.mxu0 %v3607_v25 }
 0xed3   : > { %2625 = vmatpush.bf16.msrb.mxu0 %v3606_v27 }
 0xed7   : > { %2626 = vmatpush.bf16.msrb.mxu0 %v3605_v29 }
 0xedb   : > { %2627 = vmatpush.bf16.msrb.mxu0 %v3604_v31 }
 0xf4d   : > { %v2429_v36 = vpop.f32.mrf.mxu2  ;;  %v2443_v37 = vpop.f32.mrf.mxu3 }
 0xf4e   : > { %v2430_v38 = vadd.f32 %v2429_v36, %v2336_v33  ;;  %v2444_v19 = vadd.f32 %v2443_v37, %v2337_v35 }
 0xf50   : > { %v2452_v41 = vmul.f32 0.044715, %v2430_v38  ;;  %v2453_v42 = vmul.f32 0.044715, %v2444_v19  ;;  %v2448_v5 = vmul.f32 0.5, %v2430_v38  ;;  %v2449_v9 = vmul.f32 0.5, %v2444_v19 }
 0xf52   : > { %v2456_v23 = vmul.f32 %v2452_v41, %v2430_v38  ;;  %v2457_v59 = vmul.f32 %v2453_v42, %v2444_v19  ;;  %v3625_v41 = vld [vmem:[%s4527_s16 + $0x28] sm:$0xff]  ;;  %v3624_v42 = vld [vmem:[%s4527_s16 + $0x20] sm:$0xff] }
 0xf54   : > { %v2460_v62 = vmul.f32 %v2456_v23, %v2430_v38  ;;  %v2461_v45 = vmul.f32 %v2457_v59, %v2444_v19  ;;  %v3623_v23 = vld [vmem:[%s4527_s16 + $0x18] sm:$0xff] }
 0xf55   : > { %v2431_v46 = vpop.f32.mrf.mxu2  ;;  %v2445_v47 = vpop.f32.mrf.mxu3 }
 0xf56   : > { %v2464_v48 = vadd.f32 %v2460_v62, %v2430_v38  ;;  %v2432_v50 = vadd.f32 %v2431_v46, %v2336_v33  ;;  %v2446_v51 = vadd.f32 %v2445_v47, %v2337_v35  ;;  %v2465_v34 = vadd.f32 %v2461_v45, %v2444_v19  ;;  %v3622_v45 = vld [vmem:[%s4527_s16 + $0x10] sm:$0xff]  ;;  %v3621_v47 = vld [vmem:[%s4527_s16 + $0x8] sm:$0xff] }
 0xf58   : > { %v2454_v52 = vmul.f32 0.044715, %v2432_v50  ;;  %v2455_v53 = vmul.f32 0.044715, %v2446_v51  ;;  %v2468_v11 = vmul.f32 0.7978846, %v2464_v48 }
 0xf59   : > { %v2469_v56 = vmul.f32 0.7978846, %v2465_v34  ;;  %v2450_v6 = vmul.f32 0.5, %v2432_v50  ;;  %v2451_v12 = vmul.f32 0.5, %v2446_v51 }
 0xf5a   : > { %v2458_v15 = vmul.f32 %v2454_v52, %v2432_v50  ;;  %v2459_v49 = vmul.f32 %v2455_v53, %v2446_v51  ;;  %3756 = vtanh.f32 %v2468_v11 }
 0xf5b   : > { %3758 = vtanh.f32 %v2469_v56 }
 0xf5c   : > { %v2462_v57 = vmul.f32 %v2458_v15, %v2432_v50  ;;  %v2463_v58 = vmul.f32 %v2459_v49, %v2446_v51 }
 0xf5e   : > { %v2466_v61 = vadd.f32 %v2462_v57, %v2432_v50  ;;  %v2467_v39 = vadd.f32 %v2463_v58, %v2446_v51  ;;  %v3620_v50 = vld [vmem:[%s4527_s16] sm:$0xff] }
 0xf60   : > { %v2470_v63 = vmul.f32 0.7978846, %v2466_v61  ;;  %v2471_v43 = vmul.f32 0.7978846, %v2467_v39  ;;  %v3757_v44 = vpop.eup %3756 }
 0xf61   : > { %v3759_v1 = vpop.eup %3758  ;;  %v2476_v2 = vadd.f32 1.0, %v3757_v44 }
 0xf62   : > { %3760 = vtanh.f32 %v2470_v63  ;;  %v2477_v24 = vadd.f32 1.0, %v3759_v1 }
 0xf63   : > { %3762 = vtanh.f32 %v2471_v43  ;;  %v2480_v14 = vmul.f32 %v2476_v2, %v2448_v5 }
 0xf64   : > { %v2481_v18 = vmul.f32 %v2477_v24, %v2449_v9 }
 0xf68   : > { %v3761_v3 = vpop.eup %3760 }
 0xf69   : > { %v3763_v4 = vpop.eup %3762  ;;  %v2478_v7 = vadd.f32 1.0, %v3761_v3  ;;  %v3696_v3 = vld [vmem:[%s4526_s15 + $0x1] ss:$0 sm:$0xff] }
 0xf6a   : > { %v2479_v13 = vadd.f32 1.0, %v3763_v4 }
 0xf6b   : > { %v2482_v60 = vmul.f32 %v2478_v7, %v2450_v6 }
 0xf6c   : > { %v2483_v20 = vmul.f32 %v2479_v13, %v2451_v12 }
 0xf6d   : > { %v2484_v0 = vpack.c.bf16 %v2482_v60, %v2480_v14 }
 0xf6e   : > { %v2485_v21 = vpack.c.bf16 %v2483_v20, %v2481_v18 }
 0xf6f   : > { %2628 = vmatmul.bf16.vlgmr.msrb.gmra.mxu0 %v2484_v0  ;;  %v3697_v0 = vld [vmem:[%s4528_s17] ss:$0 sm:$0xff] }
 0xf70   : > { %2642 = vmatmul.bf16.vlgmr.msra.gmra.mxu1 %v2485_v21 }
 0xfec   : > { %v2629_v54 = vpop.f32.mrf.mxu0 }
 0xfed   : > { %v2630_v40 = vadd.f32 %v3694_v22, %v2629_v54  ;;  %v2643_v55 = vpop.f32.mrf.mxu1 }
 0xfef   : > { %v2644_v25 = vadd.f32 %v2643_v55, %v2630_v40 }
 0xff1   : > { %v2648_v26 = vadd.f32 %v2644_v25, %v4452_v16  ;;  %v3627_v16 = vld [vmem:[%s4527_s16 + $0x38] sm:$0xff] }
 0xff2   : > { %2783 = vmatpush.bf16.msrb.mxu2 %v3627_v16 }
 0xff3   : > { %2654 = vadd.xlane.f32.xlu2 %v2648_v26 }
 0xff4   : > { %v2631_v27 = vpop.f32.mrf.mxu0 }
 0xff5   : > { %v2632_v28 = vadd.f32 %v3694_v22, %v2631_v27  ;;  %v2645_v29 = vpop.f32.mrf.mxu1 }
 0xff7   : > { %v2646_v10 = vadd.f32 %v2645_v29, %v2632_v28 }
 0xff9   : > { %v2649_v30 = vadd.f32 %v2646_v10, %v4454_v17  ;;  %v3626_v17 = vld [vmem:[%s4527_s16 + $0x30] sm:$0xff] }
 0xffa   : > { %2784 = vmatpush.bf16.msrb.mxu2 %v3626_v17 }
 0xffb   : > { %2656 = vadd.xlane.f32.xlu1 %v2649_v30 }
 0xffe   : > { %2785 = vmatpush.bf16.msrb.mxu2 %v3625_v41 }
0x1002   : > { %2786 = vmatpush.bf16.msrb.mxu2 %v3624_v42 }
0x1006   : > { %2787 = vmatpush.bf16.msrb.mxu2 %v3623_v23 }
0x100a   : > { %2788 = vmatpush.bf16.msrb.mxu2 %v3622_v45 }
0x100e   : > { %2789 = vmatpush.bf16.msrb.mxu2 %v3621_v47 }
0x1012   : > { %2790 = vmatpush.bf16.msrb.mxu2 %v3620_v50 }
0x1066   : > { %v2655_v31 = vpop.xlane.xlu2 %2654 }
0x1067   : > { %v2658_v32 = vmul.f32 %v2655_v31, %v4035_v8 }
0x1069   : > { %v2660_v33 = vsub.f32 %v2648_v26, %v2658_v32 }
0x106b   : > { %v2662_v35 = vmul.f32 %v2660_v33, %v2660_v33 }
0x106d   : > { %2664 = vadd.xlane.f32.xlu1 %v2662_v35 }
0x106e   : > { %v2657_v36 = vpop.xlane.xlu1 %2656 }
0x106f   : > { %v2659_v37 = vmul.f32 %v2657_v36, %v4035_v8 }
0x1071   : > { %v2661_v38 = vsub.f32 %v2649_v30, %v2659_v37 }
0x1073   : > { %v2663_v19 = vmul.f32 %v2661_v38, %v2661_v38 }
0x1075   : > { %2666 = vadd.xlane.f32.xlu0 %v2663_v19 }
0x10e0   : > { %v2665_v59 = vpop.xlane.xlu1 %2664 }
0x10e1   : > { %v2668_v62 = vmul.f32 %v2665_v59, %v4035_v8 }
0x10e3   : > { %v2670_v46 = vadd.f32 1e-12, %v2668_v62 }
0x10e5   : > { %3764 = vrsqrt.f32 %v2670_v46  ;;  %vm2678_vm13 = vweird.f32 %v2670_v46 }
0x10e8   : > { %v2667_v48 = vpop.xlane.xlu0 %2666 }
0x10e9   : > { %v2669_v51 = vmul.f32 %v2667_v48, %v4035_v8  ;;  %v3695_v8 = vld [vmem:[%s4525_s14 + $0x1] ss:$0 sm:$0xff] }
0x10eb   : > { %v3765_v34 = vpop.eup %3764  ;;  %v2671_v52 = vadd.f32 1e-12, %v2669_v51 }
0x10ec   : > { %v2673_v53 = vmul.f32 %v3765_v34, %v2670_v46  ;;  %vm2679_vm12 = vweird.f32 %v3765_v34 }
0x10ed   : > { %3766 = vrsqrt.f32 %v2671_v52  ;;  %vm2680_vm14 = vmor %vm2678_vm13, %vm2679_vm12  ;;  %vm2688_vm0 = vweird.f32 %v2671_v52 }
0x10ee   : > { %v2674_v11 = vmul.f32 %v3765_v34, %v2673_v53 }
0x10f0   : > { %v2675_v15 = vmul.f32 0.5, %v2674_v11 }
0x10f2   : > { %v2676_v56 = vsub.f32 1.5, %v2675_v15 }
0x10f3   : > { %v3767_v49 = vpop.eup %3766 }
0x10f4   : > { %v2677_v57 = vmul.f32 %v3765_v34, %v2676_v56  ;;  %v2683_v58 = vmul.f32 %v3767_v49, %v2671_v52  ;;  %vm2689_vm15 = vweird.f32 %v3767_v49 }
0x10f5   : > { %vm2690_vm1 = vmor %vm2688_vm0, %vm2689_vm15 }
0x10f6   : > { %v2681_v61 = vsel %vm2680_vm14, %v3765_v34, %v2677_v57  ;;  %v2684_v39 = vmul.f32 %v3767_v49, %v2683_v58 }
0x10f7   : > { %v2692_v43 = vmul.f32 %v2681_v61, %v2660_v33 }
0x10f8   : > { %v2685_v63 = vmul.f32 0.5, %v2684_v39 }
0x10f9   : > { %v2697_v2 = vmul.f32 %v3695_v8, %v2692_v43 }
0x10fa   : > { %v2686_v44 = vsub.f32 1.5, %v2685_v63 }
0x10fb   : > { %v2702_v6 = vadd.f32 %v3696_v3, %v2697_v2 }
0x10fc   : > { %v2687_v1 = vmul.f32 %v3767_v49, %v2686_v44 }
0x10fd   : > { %v2704_v9 = vpack.c.bf16 %v2702_v6, %v2702_v6 }
0x10fe   : > { %v2691_v24 = vsel %vm2690_vm1, %v3767_v49, %v2687_v1 }
0x10ff   : > { %v2693_v4 = vmul.f32 %v2691_v24, %v2661_v38  ;;  %v2728_v14 = vunpack.c.l.b16 %v2704_v9 }
0x1101   : > { %v2698_v5 = vmul.f32 %v3695_v8, %v2693_v4 }
0x1103   : > { %v2703_v7 = vadd.f32 %v3696_v3, %v2698_v5 }
0x1105   : > { %v2705_v12 = vpack.c.bf16 %v2703_v7, %v2703_v7 }
0x1107   : > { %v2729_v13 = vunpack.c.l.b16 %v2705_v12 }
0x1109   : > { %v2730_v60 = vrot.slane %v2729_v13, 7 }
0x110b   : > { %v2732_v18 = vsel %vm2731_vm2, %v2730_v60, %v2728_v14 }
0x110c   : > { %v2733_v20 = vpack.c.b16 %v2732_v18, %v2732_v18 }
0x110e   : > { %2791 = vmatmul.bf16.vlgmr.msrb.gmra.mxu2 %v2733_v20 }
0x1191   : > { %v2792_v21 = vpop.f32.mrf.mxu2 }
0x1192   : > { %v2793_v22 = vadd.f32 %v3697_v0, %v2792_v21 }
0x1194   : > { %3768 = vtanh.f32 %v2793_v22 }
0x1199   : > { %v2794_v54 = vpop.f32.mrf.mxu2 }
0x119a   : > { %v3769_v40 = vpop.eup %3768 }
0x119b   : > { %2797 = vst [vmem:[%s644_s25] sm:$0x3] %v3769_v40 }
0x119c PF: > { %s4544_s26 = sld [smem:[#allocation9_spill]] }
0x11a2   : > { %s30_s27 = sadd.s32 1, %s4544_s26  }
0x11a3   : > { %p27_p8 = scmp.ge.s32.totalorder %s30_s27, 4  }
0x11a5   :  { %29 = sbr.rel (!%p27_p8) target bundleno = 8 (0x8), region = 150 }
0x11aa   :  { %2817 = vsyncpa [#allocation3], 1 }
0x11ab   :  { %2819 = vsyncpa [#allocation3 + $0x1], 1 }
0x11ac   :  { %2820 = vsyncpa [#allocation5], 1 }

</bundles_post_ra>
